<compile_context>
chip_gen: v7x
topology: tpu7x:2x2x1
jax: 0.10.0
libtpu: 0.0.40
codegen_flags: <defaults>
</compile_context>

<pallas_src>
import functools
import math

import jax
import jax.numpy as jnp
from jax import lax
from jax.experimental import pallas as pl
from jax.experimental.pallas import tpu as pltpu


# ---------------------------------------------------------------------------
# tiling helpers
# ---------------------------------------------------------------------------
def _pick_tile(m, candidates):
    for t in candidates:
        if t <= m and m % t == 0:
            return t
    return m


def _row_tile(m, max_tile=512):
    cands = tuple(t for t in (1024, 512, 256, 128, 64, 32, 16, 8) if t <= max_tile)
    return _pick_tile(m, cands)


def _col_tile(n):
    # multiples of 256 preferred (v6e/v7x MXU is 256x256); 128 ok for v5e
    return _pick_tile(n, (512, 256, 128))


_PARALLEL_1D = pltpu.CompilerParams(dimension_semantics=("parallel",))
_PARALLEL_2D = pltpu.CompilerParams(dimension_semantics=("parallel", "parallel"))


# ---------------------------------------------------------------------------
# Standalone LayerNorm (only used for the embedding norm, whose output is the
# residual stream).  Matches the PyTorch module: unbiased std, eps added to std.
# ---------------------------------------------------------------------------
def _layernorm_kernel(x_ref, g_ref, b_ref, o_ref, *, eps):
    x = x_ref[...].astype(jnp.float32)
    h = x.shape[-1]
    mean = jnp.mean(x, axis=-1, keepdims=True)
    d = x - mean
    var = jnp.sum(d * d, axis=-1, keepdims=True) / (h - 1)   # torch.std (unbiased)
    y = g_ref[...] * d / (jnp.sqrt(var) + eps) + b_ref[...]
    o_ref[...] = y.astype(o_ref.dtype)


def layer_norm(x2d, gamma, beta, *, eps=1e-6, out_dtype=None):
    m, h = x2d.shape
    out_dtype = out_dtype or x2d.dtype
    tm = _row_tile(m, max_tile=1024)          # mem-bound -> big row tile
    return pl.pallas_call(
        functools.partial(_layernorm_kernel, eps=eps),
        grid=(m // tm,),
        in_specs=[
            pl.BlockSpec((tm, h), lambda i: (i, 0)),
            pl.BlockSpec((1, h), lambda i: (0, 0)),
            pl.BlockSpec((1, h), lambda i: (0, 0)),
        ],
        out_specs=pl.BlockSpec((tm, h), lambda i: (i, 0)),
        out_shape=jax.ShapeDtypeStruct((m, h), out_dtype),
        compiler_params=_PARALLEL_1D,
    )(x2d, gamma.reshape(1, h), beta.reshape(1, h))


# ---------------------------------------------------------------------------
# Linear kernel with optional fused LayerNorm prologue, GELU, residual add.
# LN / GELU / bias math in f32; matmul in the activation dtype (bf16 or f32)
# with f32 MXU accumulation.
# ---------------------------------------------------------------------------
def _linear_kernel(*refs, eps, activation, has_ln, has_residual):
    it = iter(refs)
    x_ref = next(it)
    g_ref = next(it) if has_ln else None
    beta_ref = next(it) if has_ln else None
    w_ref = next(it)
    bias_ref = next(it)
    r_ref = next(it) if has_residual else None
    o_ref = next(it)

    x = x_ref[...]
    if has_ln:
        xf = x.astype(jnp.float32)
        mean = jnp.mean(xf, axis=-1, keepdims=True)
        d = xf - mean
        var = jnp.sum(d * d, axis=-1, keepdims=True) / (xf.shape[-1] - 1)
        xn = g_ref[...] * d / (jnp.sqrt(var) + eps) + beta_ref[...]
        x = xn.astype(x_ref.dtype)            # bf16 (or f32) operand for the MXU

    y = jnp.dot(x, w_ref[...], preferred_element_type=jnp.float32)
    y = y + bias_ref[...].astype(jnp.float32)
    if activation == "gelu":
        c = math.sqrt(2.0 / math.pi)
        y = 0.5 * y * (1.0 + jnp.tanh(c * (y + 0.044715 * y * y * y)))
    if has_residual:
        y = y + r_ref[...].astype(jnp.float32)
    o_ref[...] = y.astype(o_ref.dtype)


def linear(x2d, w, bias, *, ln=None, activation=None, residual=None, eps=1e-6):
    m, k = x2d.shape
    n = w.shape[1]
    tm = _row_tile(m, max_tile=512)
    tn = _col_tile(n)                         # weight blocked along N -> VMEM safe

    in_specs = [pl.BlockSpec((tm, k), lambda i, j: (i, 0))]
    args = [x2d]
    if ln is not None:
        gamma, beta = ln
        in_specs += [pl.BlockSpec((1, k), lambda i, j: (0, 0)),
                     pl.BlockSpec((1, k), lambda i, j: (0, 0))]
        args += [gamma.reshape(1, k), beta.reshape(1, k)]
    in_specs += [pl.BlockSpec((k, tn), lambda i, j: (0, j)),
                 pl.BlockSpec((1, tn), lambda i, j: (0, j))]
    args += [w, bias.reshape(1, n)]
    if residual is not None:
        in_specs.append(pl.BlockSpec((tm, tn), lambda i, j: (i, j)))
        args.append(residual)

    return pl.pallas_call(
        functools.partial(_linear_kernel, eps=eps, activation=activation,
                          has_ln=ln is not None, has_residual=residual is not None),
        grid=(m // tm, n // tn),
        in_specs=in_specs,
        out_specs=pl.BlockSpec((tm, tn), lambda i, j: (i, j)),
        out_shape=jax.ShapeDtypeStruct((m, n), x2d.dtype),
        compiler_params=_PARALLEL_2D,
    )(*args)


# ---------------------------------------------------------------------------
# Multi-head attention: one batch per grid step.  The kernel receives the
# fused (S, 3H) QKV slab and the (1, S) key mask, slices heads with static
# column slices (no XLA transposes), and writes a lane-dense (S, H) context.
# ---------------------------------------------------------------------------
def _attention_kernel(qkv_ref, mask_ref, o_ref, *, n_heads, scale):
    h = o_ref.shape[-1]
    dk = h // n_heads
    qkv = qkv_ref[...]                        # (S, 3H), loaded once
    valid = mask_ref[...] > 0                 # (1, S) key mask, broadcasts over rows
    ctx_parts = []
    for i in range(n_heads):                  # static unroll over heads
        q = qkv[:, i * dk:(i + 1) * dk]
        k = qkv[:, h + i * dk:h + (i + 1) * dk]
        v = qkv[:, 2 * h + i * dk:2 * h + (i + 1) * dk]
        # contract last dims directly (no explicit K transpose)
        s = lax.dot_general(q, k, (((1,), (1,)), ((), ())),
                            preferred_element_type=jnp.float32) * scale
        s = jnp.where(valid, s, jnp.float32(-1e9))      # masked_fill(mask==0, -1e9)
        s = s - jnp.max(s, axis=-1, keepdims=True)
        p = jnp.exp(s)
        p = p * pl.reciprocal(jnp.sum(p, axis=-1, keepdims=True), approx=True)
        ctx_parts.append(jnp.dot(p.astype(qkv.dtype), v,
                                 preferred_element_type=jnp.float32))
    o_ref[...] = jnp.concatenate(ctx_parts, axis=-1).astype(o_ref.dtype)


def attention(qkv3, mask3, *, n_heads):
    b, s, h3 = qkv3.shape
    h = h3 // 3
    dk = h // n_heads
    return pl.pallas_call(
        functools.partial(_attention_kernel, n_heads=n_heads,
                          scale=1.0 / math.sqrt(dk)),
        grid=(b,),
        in_specs=[pl.BlockSpec((None, s, h3), lambda bi: (bi, 0, 0)),
                  pl.BlockSpec((None, 1, s), lambda bi: (bi, 0, 0))],
        out_specs=pl.BlockSpec((None, s, h), lambda bi: (bi, 0, 0)),
        out_shape=jax.ShapeDtypeStruct((b, s, h), qkv3.dtype),
        compiler_params=_PARALLEL_1D,
    )(qkv3, mask3)


# ---------------------------------------------------------------------------
# Transformer block + full BERT forward (dropout = identity in eval mode)
# ---------------------------------------------------------------------------
def transformer_block(x2, lp, mask3, *, b, s, n_heads):
    h = x2.shape[-1]
    # sublayer 1: pre-norm MHA — fused LN + QKV projection, then attention,
    # then output projection with fused residual.
    qkv = linear(x2, lp["wqkv"], lp["bqkv"], ln=(lp["ln1_g"], lp["ln1_b"]))
    ctx = attention(qkv.reshape(b, s, 3 * h), mask3, n_heads=n_heads)
    x2 = linear(ctx.reshape(b * s, h), lp["wo"], lp["bo"], residual=x2)

    # sublayer 2: pre-norm FFN — fused LN + W1 + GELU, then W2 + residual.
    hmid = linear(x2, lp["w1"], lp["b1"], ln=(lp["ln2_g"], lp["ln2_b"]),
                  activation="gelu")
    x2 = linear(hmid, lp["w2"], lp["b2"], residual=x2)
    return x2


def bert_forward(tokens, segments, params, *, n_heads, compute_dtype=jnp.float32):
    b, s = tokens.shape
    h = params["tok_emb"].shape[1]

    # Compact key-only padding mask: (B, 1, S) int32 (never materialize (B,S,S)).
    mask3 = (tokens > 0).astype(jnp.int32)[:, None, :]

    # TODO(synk): token/segment embedding gathers stay in XLA; a Pallas version
    # would need scalar-prefetch + pl.Element row DMAs.
    emb = (params["tok_emb"][tokens]
           + params["pos_emb"][None, :s, :]
           + params["seg_emb"][segments])

    # Embedding LayerNorm produces the residual stream in the compute dtype.
    x2 = layer_norm(emb.reshape(b * s, h), params["emb_ln_g"], params["emb_ln_b"],
                    out_dtype=compute_dtype)

    # One-time per-call weight packing: fuse Wq|Wk|Wv and cast matmul weights
    # to the compute dtype (bf16 halves weight DMA / VMEM; f32 accumulation).
    packed = []
    for p in params["layers"]:
        packed.append({
            "wqkv": jnp.concatenate([p["wq"], p["wk"], p["wv"]], axis=1)
                       .astype(compute_dtype),
            "bqkv": jnp.concatenate([p["bq"], p["bk"], p["bv"]], axis=0),
            "wo": p["wo"].astype(compute_dtype), "bo": p["bo"],
            "w1": p["w1"].astype(compute_dtype), "b1": p["b1"],
            "w2": p["w2"].astype(compute_dtype), "b2": p["b2"],
            "ln1_g": p["ln1_g"], "ln1_b": p["ln1_b"],
            "ln2_g": p["ln2_g"], "ln2_b": p["ln2_b"],
        })

    for lp in packed:
        x2 = transformer_block(x2, lp, mask3, b=b, s=s, n_heads=n_heads)
    return x2.reshape(b, s, h)


# ---------------------------------------------------------------------------
# Pure-JAX reference mirroring the PyTorch forward (eval mode, f32)
# ---------------------------------------------------------------------------
def _reference_bert(tokens, segments, params, *, n_heads):
    def ln(x, g, bta, eps=1e-6):
        mean = x.mean(-1, keepdims=True)
        var = jnp.sum((x - mean) ** 2, -1, keepdims=True) / (x.shape[-1] - 1)
        return g * (x - mean) / (jnp.sqrt(var) + eps) + bta

    def gelu(x):
        return 0.5 * x * (1.0 + jnp.tanh(math.sqrt(2.0 / math.pi)
                                         * (x + 0.044715 * x ** 3)))

    b, s = tokens.shape
    h = params["tok_emb"].shape[1]
    dk = h // n_heads
    mask4 = (tokens > 0)[:, None, None, :]

    x = (params["tok_emb"][tokens] + params["pos_emb"][None, :s, :]
         + params["seg_emb"][segments])
    x = ln(x, params["emb_ln_g"], params["emb_ln_b"])
    for p in params["layers"]:
        xn = ln(x, p["ln1_g"], p["ln1_b"])
        q = xn @ p["wq"] + p["bq"]
        k = xn @ p["wk"] + p["bk"]
        v = xn @ p["wv"] + p["bv"]

        def split(t):
            return t.reshape(b, s, n_heads, dk).transpose(0, 2, 1, 3)

        qh, kh, vh = split(q), split(k), split(v)
        scores = jnp.einsum("bhqd,bhkd->bhqk", qh, kh) / math.sqrt(dk)
        scores = jnp.where(mask4, scores, -1e9)
        attn = jax.nn.softmax(scores, axis=-1)
        ctx = jnp.einsum("bhqk,bhkd->bhqd", attn, vh)
        ctx = ctx.transpose(0, 2, 1, 3).reshape(b, s, h)
        x = x + (ctx @ p["wo"] + p["bo"])

        xn = ln(x, p["ln2_g"], p["ln2_b"])
        x = x + (gelu(xn @ p["w1"] + p["b1"]) @ p["w2"] + p["b2"])
    return x


# ---------------------------------------------------------------------------
# Deterministic parameter construction
# ---------------------------------------------------------------------------
def init_params(key, *, vocab_size, hidden, n_layers, n_heads, max_len):
    del n_heads  # head count only affects the forward, not parameter shapes
    d_ff = hidden * 4
    keys = jax.random.split(key, 4 + n_layers)

    def dense(k, shape):
        return jax.random.normal(k, shape, jnp.float32) / math.sqrt(shape[0])

    def small(k, shape):
        return 0.02 * jax.random.normal(k, shape, jnp.float32)

    tok = jax.random.normal(keys[0], (vocab_size, hidden), jnp.float32).at[0].set(0.0)
    seg = jax.random.normal(keys[1], (2, hidden), jnp.float32).at[0].set(0.0)

    pos = jnp.arange(max_len, dtype=jnp.float32)[:, None]
    div = jnp.exp(jnp.arange(0, hidden, 2, dtype=jnp.float32)
                  * (-math.log(10000.0) / hidden))
    pe = jnp.zeros((max_len, hidden), jnp.float32)
    pe = pe.at[:, 0::2].set(jnp.sin(pos * div))
    pe = pe.at[:, 1::2].set(jnp.cos(pos * div))

    kg, kb = jax.random.split(keys[2])
    params = {
        "tok_emb": tok,
        "seg_emb": seg,
        "pos_emb": pe,
        "emb_ln_g": 1.0 + 0.05 * jax.random.normal(kg, (hidden,), jnp.float32),
        "emb_ln_b": 0.05 * jax.random.normal(kb, (hidden,), jnp.float32),
        "layers": [],
    }
    for li in range(n_layers):
        lk = jax.random.split(keys[4 + li], 12)
        params["layers"].append({
            "wq": dense(lk[0], (hidden, hidden)), "bq": small(lk[1], (hidden,)),
            "wk": dense(lk[2], (hidden, hidden)), "bk": small(lk[3], (hidden,)),
            "wv": dense(lk[4], (hidden, hidden)), "bv": small(lk[5], (hidden,)),
            "wo": dense(lk[6], (hidden, hidden)), "bo": small(lk[7], (hidden,)),
            "w1": dense(lk[8], (hidden, d_ff)),   "b1": small(lk[9], (d_ff,)),
            "w2": dense(lk[10], (d_ff, hidden)),  "b2": small(lk[11], (hidden,)),
            "ln1_g": jnp.ones((hidden,), jnp.float32),
            "ln1_b": jnp.zeros((hidden,), jnp.float32),
            "ln2_g": jnp.ones((hidden,), jnp.float32),
            "ln2_b": jnp.zeros((hidden,), jnp.float32),
        })
    return params


if __name__ == "__main__":
    VOCAB, HIDDEN, LAYERS, HEADS = 50, 32, 2, 4
    B, S, MAX_LEN = 2, 8, 16

    root = jax.random.PRNGKey(0)
    kp, kt, ks = jax.random.split(root, 3)
    params = init_params(kp, vocab_size=VOCAB, hidden=HIDDEN,
                         n_layers=LAYERS, n_heads=HEADS, max_len=MAX_LEN)

    tokens = jax.random.randint(kt, (B, S), 1, VOCAB)
    tokens = tokens.at[1, 6:].set(0)                  # padding -> exercises the mask
    segments = jax.random.randint(ks, (B, S), 0, 2)

    ref = _reference_bert(tokens, segments, params, n_heads=HEADS)

    # f32 path: correctness check against the reference.
    fwd32 = jax.jit(functools.partial(bert_forward, n_heads=HEADS,
                                      compute_dtype=jnp.float32))
    out32 = jax.block_until_ready(fwd32(tokens, segments, params))
    assert out32.shape == (B, S, HIDDEN), out32.shape
    err32 = float(jnp.max(jnp.abs(out32 - ref)))
    assert err32 < 1e-2, f"f32 max err {err32}"

    # bf16 path: the performance configuration (bf16 matmuls, f32 accumulation).
    fwd16 = jax.jit(functools.partial(bert_forward, n_heads=HEADS,
                                      compute_dtype=jnp.bfloat16))
    out16 = jax.block_until_ready(fwd16(tokens, segments, params))
    err16 = float(jnp.max(jnp.abs(out16.astype(jnp.float32) - ref)))
    assert err16 < 0.25, f"bf16 max err {err16}"   # loose: bf16 rounding vs f32 ref

    print("KERNEL_OK")
</pallas_src>

<mosaic_0001>
module attributes {stable_mosaic.version = 11 : i64} {
  func.func @_layernorm_kernel(%arg0: i32, %arg1: memref<16x32xf32, #tpu.memory_space<vmem>>, %arg2: memref<1x32xf32, #tpu.memory_space<vmem>>, %arg3: memref<1x32xf32, #tpu.memory_space<vmem>>, %arg4: memref<16x32xf32, #tpu.memory_space<vmem>>) attributes {dimension_semantics = [#tpu.dimension_semantics<parallel>], iteration_bounds = array<i64: 1>, scalar_prefetch = 0 : i64, scratch_operands = 0 : i64, tpu.core_type = #tpu.core_type<tc>, window_params = [{transform_indices = @transform_0, window_bounds = array<i64: 16, 32>}, {pipeline_mode = #tpu.pipeline_mode<synchronous>, transform_indices = @transform_1, window_bounds = array<i64: 1, 32>}, {pipeline_mode = #tpu.pipeline_mode<synchronous>, transform_indices = @transform_2, window_bounds = array<i64: 1, 32>}, {transform_indices = @transform_3, window_bounds = array<i64: 16, 32>}]} {
    %c0 = arith.constant 0 : index
    %c0_0 = arith.constant 0 : index
    %0 = vector.load %arg1[%c0, %c0_0] : memref<16x32xf32, #tpu.memory_space<vmem>>, vector<16x32xf32>
    %cst = arith.constant dense<0.000000e+00> : vector<16xf32>
    %1 = vector.multi_reduction <add>, %0, %cst [1] : vector<16x32xf32> to vector<16xf32>
    %2 = vector.shape_cast %1 : vector<16xf32> to vector<16x1xf32>
    %cst_1 = arith.constant 3.200000e+01 : f32
    %3 = vector.broadcast %cst_1 : f32 to vector<16x1xf32>
    %4 = arith.divf %2, %3 : vector<16x1xf32>
    %5 = vector.broadcast %4 : vector<16x1xf32> to vector<16x32xf32>
    %6 = arith.subf %0, %5 : vector<16x32xf32>
    %7 = arith.mulf %6, %6 : vector<16x32xf32>
    %cst_2 = arith.constant dense<0.000000e+00> : vector<16xf32>
    %8 = vector.multi_reduction <add>, %7, %cst_2 [1] : vector<16x32xf32> to vector<16xf32>
    %9 = vector.shape_cast %8 : vector<16xf32> to vector<16x1xf32>
    %cst_3 = arith.constant 3.100000e+01 : f32
    %10 = vector.broadcast %cst_3 : f32 to vector<16x1xf32>
    %11 = arith.divf %9, %10 : vector<16x1xf32>
    %c0_4 = arith.constant 0 : index
    %c0_5 = arith.constant 0 : index
    %12 = vector.load %arg2[%c0_4, %c0_5] : memref<1x32xf32, #tpu.memory_space<vmem>>, vector<1x32xf32>
    %13 = vector.broadcast %12 : vector<1x32xf32> to vector<16x32xf32>
    %14 = arith.mulf %13, %6 : vector<16x32xf32>
    %15 = math.sqrt %11 : vector<16x1xf32>
    %cst_6 = arith.constant 9.99999997E-7 : f32
    %16 = vector.broadcast %cst_6 : f32 to vector<16x1xf32>
    %17 = arith.addf %15, %16 : vector<16x1xf32>
    %18 = vector.broadcast %17 : vector<16x1xf32> to vector<16x32xf32>
    %19 = arith.divf %14, %18 : vector<16x32xf32>
    %c0_7 = arith.constant 0 : index
    %c0_8 = arith.constant 0 : index
    %20 = vector.load %arg3[%c0_7, %c0_8] : memref<1x32xf32, #tpu.memory_space<vmem>>, vector<1x32xf32>
    %21 = vector.broadcast %20 : vector<1x32xf32> to vector<16x32xf32>
    %22 = arith.addf %19, %21 : vector<16x32xf32>
    %c0_9 = arith.constant 0 : index
    %c0_10 = arith.constant 0 : index
    %23 = vector.load %arg4[%c0_9, %c0_10] : memref<16x32xf32, #tpu.memory_space<vmem>>, vector<16x32xf32>
    tpu.vector_store %arg4[%c0_9, %c0_10], %22 {strides = array<i32>} : memref<16x32xf32, #tpu.memory_space<vmem>>, vector<16x32xf32>,
    return
  }
  func.func @transform_0(%arg0: i32) -> (i32, i32) {
    %c0_i32 = arith.constant 0 : i32
    %c0_i32_0 = arith.constant 0 : i32
    return %arg0, %c0_i32 : i32, i32
  }
  func.func @transform_1(%arg0: i32) -> (i32, i32) {
    %c0_i32 = arith.constant 0 : i32
    %c0_i32_0 = arith.constant 0 : i32
    %c0_i32_1 = arith.constant 0 : i32
    return %c0_i32, %c0_i32_0 : i32, i32
  }
  func.func @transform_2(%arg0: i32) -> (i32, i32) {
    %c0_i32 = arith.constant 0 : i32
    %c0_i32_0 = arith.constant 0 : i32
    %c0_i32_1 = arith.constant 0 : i32
    return %c0_i32, %c0_i32_0 : i32, i32
  }
  func.func @transform_3(%arg0: i32) -> (i32, i32) {
    %c0_i32 = arith.constant 0 : i32
    %c0_i32_0 = arith.constant 0 : i32
    return %arg0, %c0_i32 : i32, i32
  }
}

module attributes {stable_mosaic.version = 11 : i64} {
  func.func @_linear_kernel(%arg0: i32, %arg1: i32, %arg2: memref<16x32xf32, #tpu.memory_space<vmem>>, %arg3: memref<1x32xf32, #tpu.memory_space<vmem>>, %arg4: memref<1x32xf32, #tpu.memory_space<vmem>>, %arg5: memref<32x96xf32, #tpu.memory_space<vmem>>, %arg6: memref<1x96xf32, #tpu.memory_space<vmem>>, %arg7: memref<16x96xf32, #tpu.memory_space<vmem>>) attributes {dimension_semantics = [#tpu.dimension_semantics<parallel>, #tpu.dimension_semantics<parallel>], iteration_bounds = array<i64: 1, 1>, scalar_prefetch = 0 : i64, scratch_operands = 0 : i64, tpu.core_type = #tpu.core_type<tc>, window_params = [{transform_indices = @transform_0, window_bounds = array<i64: 16, 32>}, {pipeline_mode = #tpu.pipeline_mode<synchronous>, transform_indices = @transform_1, window_bounds = array<i64: 1, 32>}, {pipeline_mode = #tpu.pipeline_mode<synchronous>, transform_indices = @transform_2, window_bounds = array<i64: 1, 32>}, {transform_indices = @transform_3, window_bounds = array<i64: 32, 96>}, {transform_indices = @transform_4, window_bounds = array<i64: 1, 96>}, {transform_indices = @transform_5, window_bounds = array<i64: 16, 96>}]} {
    %c0 = arith.constant 0 : index
    %c0_0 = arith.constant 0 : index
    %0 = vector.load %arg2[%c0, %c0_0] : memref<16x32xf32, #tpu.memory_space<vmem>>, vector<16x32xf32>
    %cst = arith.constant dense<0.000000e+00> : vector<16xf32>
    %1 = vector.multi_reduction <add>, %0, %cst [1] : vector<16x32xf32> to vector<16xf32>
    %2 = vector.shape_cast %1 : vector<16xf32> to vector<16x1xf32>
    %cst_1 = arith.constant 3.200000e+01 : f32
    %3 = vector.broadcast %cst_1 : f32 to vector<16x1xf32>
    %4 = arith.divf %2, %3 : vector<16x1xf32>
    %5 = vector.broadcast %4 : vector<16x1xf32> to vector<16x32xf32>
    %6 = arith.subf %0, %5 : vector<16x32xf32>
    %7 = arith.mulf %6, %6 : vector<16x32xf32>
    %cst_2 = arith.constant dense<0.000000e+00> : vector<16xf32>
    %8 = vector.multi_reduction <add>, %7, %cst_2 [1] : vector<16x32xf32> to vector<16xf32>
    %9 = vector.shape_cast %8 : vector<16xf32> to vector<16x1xf32>
    %cst_3 = arith.constant 3.100000e+01 : f32
    %10 = vector.broadcast %cst_3 : f32 to vector<16x1xf32>
    %11 = arith.divf %9, %10 : vector<16x1xf32>
    %c0_4 = arith.constant 0 : index
    %c0_5 = arith.constant 0 : index
    %12 = vector.load %arg3[%c0_4, %c0_5] : memref<1x32xf32, #tpu.memory_space<vmem>>, vector<1x32xf32>
    %13 = vector.broadcast %12 : vector<1x32xf32> to vector<16x32xf32>
    %14 = arith.mulf %13, %6 : vector<16x32xf32>
    %15 = math.sqrt %11 : vector<16x1xf32>
    %cst_6 = arith.constant 9.99999997E-7 : f32
    %16 = vector.broadcast %cst_6 : f32 to vector<16x1xf32>
    %17 = arith.addf %15, %16 : vector<16x1xf32>
    %18 = vector.broadcast %17 : vector<16x1xf32> to vector<16x32xf32>
    %19 = arith.divf %14, %18 : vector<16x32xf32>
    %c0_7 = arith.constant 0 : index
    %c0_8 = arith.constant 0 : index
    %20 = vector.load %arg4[%c0_7, %c0_8] : memref<1x32xf32, #tpu.memory_space<vmem>>, vector<1x32xf32>
    %21 = vector.broadcast %20 : vector<1x32xf32> to vector<16x32xf32>
    %22 = arith.addf %19, %21 : vector<16x32xf32>
    %c0_9 = arith.constant 0 : index
    %c0_10 = arith.constant 0 : index
    %23 = vector.load %arg5[%c0_9, %c0_10] : memref<32x96xf32, #tpu.memory_space<vmem>>, vector<32x96xf32>
    %cst_11 = arith.constant dense<0.000000e+00> : vector<16x96xf32>
    %24 = tpu.matmul %22, %23, %cst_11 {dimension_numbers = #tpu.dot_dimension_numbers<[1], [0], [0], [1], [0, 0, 1, 1], [], []>} : vector<16x32xf32>, vector<32x96xf32>, vector<16x96xf32> -> vector<16x96xf32>
    %c0_12 = arith.constant 0 : index
    %c0_13 = arith.constant 0 : index
    %25 = vector.load %arg6[%c0_12, %c0_13] : memref<1x96xf32, #tpu.memory_space<vmem>>, vector<1x96xf32>
    %26 = vector.broadcast %25 : vector<1x96xf32> to vector<16x96xf32>
    %27 = arith.addf %24, %26 : vector<16x96xf32>
    %c0_14 = arith.constant 0 : index
    %c0_15 = arith.constant 0 : index
    %28 = vector.load %arg7[%c0_14, %c0_15] : memref<16x96xf32, #tpu.memory_space<vmem>>, vector<16x96xf32>
    tpu.vector_store %arg7[%c0_14, %c0_15], %27 {strides = array<i32>} : memref<16x96xf32, #tpu.memory_space<vmem>>, vector<16x96xf32>,
    return
  }
  func.func @transform_0(%arg0: i32, %arg1: i32) -> (i32, i32) {
    %c0_i32 = arith.constant 0 : i32
    %c0_i32_0 = arith.constant 0 : i32
    return %arg0, %c0_i32 : i32, i32
  }
  func.func @transform_1(%arg0: i32, %arg1: i32) -> (i32, i32) {
    %c0_i32 = arith.constant 0 : i32
    %c0_i32_0 = arith.constant 0 : i32
    %c0_i32_1 = arith.constant 0 : i32
    return %c0_i32, %c0_i32_0 : i32, i32
  }
  func.func @transform_2(%arg0: i32, %arg1: i32) -> (i32, i32) {
    %c0_i32 = arith.constant 0 : i32
    %c0_i32_0 = arith.constant 0 : i32
    %c0_i32_1 = arith.constant 0 : i32
    return %c0_i32, %c0_i32_0 : i32, i32
  }
  func.func @transform_3(%arg0: i32, %arg1: i32) -> (i32, i32) {
    %c0_i32 = arith.constant 0 : i32
    %c0_i32_0 = arith.constant 0 : i32
    return %c0_i32, %arg1 : i32, i32
  }
  func.func @transform_4(%arg0: i32, %arg1: i32) -> (i32, i32) {
    %c0_i32 = arith.constant 0 : i32
    %c0_i32_0 = arith.constant 0 : i32
    return %c0_i32, %arg1 : i32, i32
  }
  func.func @transform_5(%arg0: i32, %arg1: i32) -> (i32, i32) {
    %c0_i32 = arith.constant 0 : i32
    return %arg0, %arg1 : i32, i32
  }
}

module attributes {stable_mosaic.version = 11 : i64} {
  func.func @_linear_kernel(%arg0: i32, %arg1: i32, %arg2: memref<16x32xf32, #tpu.memory_space<vmem>>, %arg3: memref<32x32xf32, #tpu.memory_space<vmem>>, %arg4: memref<1x32xf32, #tpu.memory_space<vmem>>, %arg5: memref<16x32xf32, #tpu.memory_space<vmem>>, %arg6: memref<16x32xf32, #tpu.memory_space<vmem>>) attributes {dimension_semantics = [#tpu.dimension_semantics<parallel>, #tpu.dimension_semantics<parallel>], iteration_bounds = array<i64: 1, 1>, scalar_prefetch = 0 : i64, scratch_operands = 0 : i64, tpu.core_type = #tpu.core_type<tc>, window_params = [{transform_indices = @transform_0, window_bounds = array<i64: 16, 32>}, {transform_indices = @transform_1, window_bounds = array<i64: 32, 32>}, {transform_indices = @transform_2, window_bounds = array<i64: 1, 32>}, {transform_indices = @transform_3, window_bounds = array<i64: 16, 32>}, {transform_indices = @transform_4, window_bounds = array<i64: 16, 32>}]} {
    %c0 = arith.constant 0 : index
    %c0_0 = arith.constant 0 : index
    %0 = vector.load %arg2[%c0, %c0_0] : memref<16x32xf32, #tpu.memory_space<vmem>>, vector<16x32xf32>
    %c0_1 = arith.constant 0 : index
    %c0_2 = arith.constant 0 : index
    %1 = vector.load %arg3[%c0_1, %c0_2] : memref<32x32xf32, #tpu.memory_space<vmem>>, vector<32x32xf32>
    %cst = arith.constant dense<0.000000e+00> : vector<16x32xf32>
    %2 = tpu.matmul %0, %1, %cst {dimension_numbers = #tpu.dot_dimension_numbers<[1], [0], [0], [1], [0, 0, 1, 1], [], []>} : vector<16x32xf32>, vector<32x32xf32>, vector<16x32xf32> -> vector<16x32xf32>
    %c0_3 = arith.constant 0 : index
    %c0_4 = arith.constant 0 : index
    %3 = vector.load %arg4[%c0_3, %c0_4] : memref<1x32xf32, #tpu.memory_space<vmem>>, vector<1x32xf32>
    %4 = vector.broadcast %3 : vector<1x32xf32> to vector<16x32xf32>
    %5 = arith.addf %2, %4 : vector<16x32xf32>
    %c0_5 = arith.constant 0 : index
    %c0_6 = arith.constant 0 : index
    %6 = vector.load %arg5[%c0_5, %c0_6] : memref<16x32xf32, #tpu.memory_space<vmem>>, vector<16x32xf32>
    %7 = arith.addf %5, %6 : vector<16x32xf32>
    %c0_7 = arith.constant 0 : index
    %c0_8 = arith.constant 0 : index
    %8 = vector.load %arg6[%c0_7, %c0_8] : memref<16x32xf32, #tpu.memory_space<vmem>>, vector<16x32xf32>
    tpu.vector_store %arg6[%c0_7, %c0_8], %7 {strides = array<i32>} : memref<16x32xf32, #tpu.memory_space<vmem>>, vector<16x32xf32>,
    return
  }
  func.func @transform_0(%arg0: i32, %arg1: i32) -> (i32, i32) {
    %c0_i32 = arith.constant 0 : i32
    %c0_i32_0 = arith.constant 0 : i32
    return %arg0, %c0_i32 : i32, i32
  }
  func.func @transform_1(%arg0: i32, %arg1: i32) -> (i32, i32) {
    %c0_i32 = arith.constant 0 : i32
    %c0_i32_0 = arith.constant 0 : i32
    return %c0_i32, %arg1 : i32, i32
  }
  func.func @transform_2(%arg0: i32, %arg1: i32) -> (i32, i32) {
    %c0_i32 = arith.constant 0 : i32
    %c0_i32_0 = arith.constant 0 : i32
    return %c0_i32, %arg1 : i32, i32
  }
  func.func @transform_3(%arg0: i32, %arg1: i32) -> (i32, i32) {
    %c0_i32 = arith.constant 0 : i32
    return %arg0, %arg1 : i32, i32
  }
  func.func @transform_4(%arg0: i32, %arg1: i32) -> (i32, i32) {
    %c0_i32 = arith.constant 0 : i32
    return %arg0, %arg1 : i32, i32
  }
}

module attributes {stable_mosaic.version = 11 : i64} {
  func.func @_attention_kernel(%arg0: i32, %arg1: memref<1x8x96xf32, #tpu.memory_space<vmem>>, %arg2: memref<1x1x8xi32, #tpu.memory_space<vmem>>, %arg3: memref<1x8x32xf32, #tpu.memory_space<vmem>>) attributes {dimension_semantics = [#tpu.dimension_semantics<parallel>], iteration_bounds = array<i64: 2>, scalar_prefetch = 0 : i64, scratch_operands = 0 : i64, tpu.core_type = #tpu.core_type<tc>, window_params = [{transform_indices = @transform_0, window_bounds = array<i64: 1, 8, 96>}, {transform_indices = @transform_1, window_bounds = array<i64: 1, 1, 8>}, {transform_indices = @transform_2, window_bounds = array<i64: 1, 8, 32>}]} {
    %c0 = arith.constant 0 : index
    %c0_0 = arith.constant 0 : index
    %c0_1 = arith.constant 0 : index
    %0 = vector.load %arg1[%c0, %c0_0, %c0_1] : memref<1x8x96xf32, #tpu.memory_space<vmem>>, vector<1x8x96xf32>
    %1 = vector.shape_cast %0 : vector<1x8x96xf32> to vector<8x96xf32>
    %c0_2 = arith.constant 0 : index
    %c0_3 = arith.constant 0 : index
    %c0_4 = arith.constant 0 : index
    %2 = vector.load %arg2[%c0_2, %c0_3, %c0_4] : memref<1x1x8xi32, #tpu.memory_space<vmem>>, vector<1x1x8xi32>
    %3 = vector.shape_cast %2 : vector<1x1x8xi32> to vector<1x8xi32>
    %c0_i32 = arith.constant 0 : i32
    %4 = vector.broadcast %c0_i32 : i32 to vector<1x8xi32>
    %5 = arith.cmpi sgt, %3, %4 : vector<1x8xi32>
    %6 = vector.extract_strided_slice %1 {offsets = [0, 0], sizes = [8, 8], strides = [1, 1]} : vector<8x96xf32> to vector<8x8xf32>
    %7 = vector.extract_strided_slice %1 {offsets = [0, 32], sizes = [8, 8], strides = [1, 1]} : vector<8x96xf32> to vector<8x8xf32>
    %8 = vector.extract_strided_slice %1 {offsets = [0, 64], sizes = [8, 8], strides = [1, 1]} : vector<8x96xf32> to vector<8x8xf32>
    %cst = arith.constant dense<0.000000e+00> : vector<8x8xf32>
    %9 = tpu.matmul %6, %7, %cst {dimension_numbers = #tpu.dot_dimension_numbers<[1], [1], [0], [0], [0, 0, 1, 0], [], []>} : vector<8x8xf32>, vector<8x8xf32>, vector<8x8xf32> -> vector<8x8xf32>
    %cst_5 = arith.constant 0.353553385 : f32
    %10 = vector.broadcast %cst_5 : f32 to vector<8x8xf32>
    %11 = arith.mulf %9, %10 : vector<8x8xf32>
    %cst_6 = arith.constant -1.000000e+09 : f32
    %12 = vector.shape_cast %5 : vector<1x8xi1> to vector<1x8xi1>
    %13 = vector.broadcast %12 : vector<1x8xi1> to vector<8x8xi1>
    %14 = vector.broadcast %cst_6 : f32 to vector<8x8xf32>
    %15 = arith.select %13, %11, %14 : vector<8x8xi1>, vector<8x8xf32>
    %cst_7 = arith.constant dense<0xFF800000> : vector<8xf32>
    %16 = vector.multi_reduction <maximumf>, %15, %cst_7 [1] : vector<8x8xf32> to vector<8xf32>
    %17 = vector.shape_cast %16 : vector<8xf32> to vector<8x1xf32>
    %18 = vector.broadcast %17 : vector<8x1xf32> to vector<8x8xf32>
    %19 = arith.subf %15, %18 : vector<8x8xf32>
    %20 = math.exp %19 : vector<8x8xf32>
    %cst_8 = arith.constant dense<0.000000e+00> : vector<8xf32>
    %21 = vector.multi_reduction <add>, %20, %cst_8 [1] : vector<8x8xf32> to vector<8xf32>
    %22 = vector.shape_cast %21 : vector<8xf32> to vector<8x1xf32>
    %23 = tpu.reciprocal %22 {approx = true} : vector<8x1xf32> -> vector<8x1xf32>
    %24 = vector.broadcast %23 : vector<8x1xf32> to vector<8x8xf32>
    %25 = arith.mulf %20, %24 : vector<8x8xf32>
    %cst_9 = arith.constant dense<0.000000e+00> : vector<8x8xf32>
    %26 = tpu.matmul %25, %8, %cst_9 {dimension_numbers = #tpu.dot_dimension_numbers<[1], [0], [0], [1], [0, 0, 1, 1], [], []>} : vector<8x8xf32>, vector<8x8xf32>, vector<8x8xf32> -> vector<8x8xf32>
    %27 = vector.extract_strided_slice %1 {offsets = [0, 8], sizes = [8, 8], strides = [1, 1]} : vector<8x96xf32> to vector<8x8xf32>
    %28 = vector.extract_strided_slice %1 {offsets = [0, 40], sizes = [8, 8], strides = [1, 1]} : vector<8x96xf32> to vector<8x8xf32>
    %29 = vector.extract_strided_slice %1 {offsets = [0, 72], sizes = [8, 8], strides = [1, 1]} : vector<8x96xf32> to vector<8x8xf32>
    %cst_10 = arith.constant dense<0.000000e+00> : vector<8x8xf32>
    %30 = tpu.matmul %27, %28, %cst_10 {dimension_numbers = #tpu.dot_dimension_numbers<[1], [1], [0], [0], [0, 0, 1, 0], [], []>} : vector<8x8xf32>, vector<8x8xf32>, vector<8x8xf32> -> vector<8x8xf32>
    %cst_11 = arith.constant 0.353553385 : f32
    %31 = vector.broadcast %cst_11 : f32 to vector<8x8xf32>
    %32 = arith.mulf %30, %31 : vector<8x8xf32>
    %cst_12 = arith.constant -1.000000e+09 : f32
    %33 = vector.shape_cast %5 : vector<1x8xi1> to vector<1x8xi1>
    %34 = vector.broadcast %33 : vector<1x8xi1> to vector<8x8xi1>
    %35 = vector.broadcast %cst_12 : f32 to vector<8x8xf32>
    %36 = arith.select %34, %32, %35 : vector<8x8xi1>, vector<8x8xf32>
    %cst_13 = arith.constant dense<0xFF800000> : vector<8xf32>
    %37 = vector.multi_reduction <maximumf>, %36, %cst_13 [1] : vector<8x8xf32> to vector<8xf32>
    %38 = vector.shape_cast %37 : vector<8xf32> to vector<8x1xf32>
    %39 = vector.broadcast %38 : vector<8x1xf32> to vector<8x8xf32>
    %40 = arith.subf %36, %39 : vector<8x8xf32>
    %41 = math.exp %40 : vector<8x8xf32>
    %cst_14 = arith.constant dense<0.000000e+00> : vector<8xf32>
    %42 = vector.multi_reduction <add>, %41, %cst_14 [1] : vector<8x8xf32> to vector<8xf32>
    %43 = vector.shape_cast %42 : vector<8xf32> to vector<8x1xf32>
    %44 = tpu.reciprocal %43 {approx = true} : vector<8x1xf32> -> vector<8x1xf32>
    %45 = vector.broadcast %44 : vector<8x1xf32> to vector<8x8xf32>
    %46 = arith.mulf %41, %45 : vector<8x8xf32>
    %cst_15 = arith.constant dense<0.000000e+00> : vector<8x8xf32>
    %47 = tpu.matmul %46, %29, %cst_15 {dimension_numbers = #tpu.dot_dimension_numbers<[1], [0], [0], [1], [0, 0, 1, 1], [], []>} : vector<8x8xf32>, vector<8x8xf32>, vector<8x8xf32> -> vector<8x8xf32>
    %48 = vector.extract_strided_slice %1 {offsets = [0, 16], sizes = [8, 8], strides = [1, 1]} : vector<8x96xf32> to vector<8x8xf32>
    %49 = vector.extract_strided_slice %1 {offsets = [0, 48], sizes = [8, 8], strides = [1, 1]} : vector<8x96xf32> to vector<8x8xf32>
    %50 = vector.extract_strided_slice %1 {offsets = [0, 80], sizes = [8, 8], strides = [1, 1]} : vector<8x96xf32> to vector<8x8xf32>
    %cst_16 = arith.constant dense<0.000000e+00> : vector<8x8xf32>
    %51 = tpu.matmul %48, %49, %cst_16 {dimension_numbers = #tpu.dot_dimension_numbers<[1], [1], [0], [0], [0, 0, 1, 0], [], []>} : vector<8x8xf32>, vector<8x8xf32>, vector<8x8xf32> -> vector<8x8xf32>
    %cst_17 = arith.constant 0.353553385 : f32
    %52 = vector.broadcast %cst_17 : f32 to vector<8x8xf32>
    %53 = arith.mulf %51, %52 : vector<8x8xf32>
    %cst_18 = arith.constant -1.000000e+09 : f32
    %54 = vector.shape_cast %5 : vector<1x8xi1> to vector<1x8xi1>
    %55 = vector.broadcast %54 : vector<1x8xi1> to vector<8x8xi1>
    %56 = vector.broadcast %cst_18 : f32 to vector<8x8xf32>
    %57 = arith.select %55, %53, %56 : vector<8x8xi1>, vector<8x8xf32>
    %cst_19 = arith.constant dense<0xFF800000> : vector<8xf32>
    %58 = vector.multi_reduction <maximumf>, %57, %cst_19 [1] : vector<8x8xf32> to vector<8xf32>
    %59 = vector.shape_cast %58 : vector<8xf32> to vector<8x1xf32>
    %60 = vector.broadcast %59 : vector<8x1xf32> to vector<8x8xf32>
    %61 = arith.subf %57, %60 : vector<8x8xf32>
    %62 = math.exp %61 : vector<8x8xf32>
    %cst_20 = arith.constant dense<0.000000e+00> : vector<8xf32>
    %63 = vector.multi_reduction <add>, %62, %cst_20 [1] : vector<8x8xf32> to vector<8xf32>
    %64 = vector.shape_cast %63 : vector<8xf32> to vector<8x1xf32>
    %65 = tpu.reciprocal %64 {approx = true} : vector<8x1xf32> -> vector<8x1xf32>
    %66 = vector.broadcast %65 : vector<8x1xf32> to vector<8x8xf32>
    %67 = arith.mulf %62, %66 : vector<8x8xf32>
    %cst_21 = arith.constant dense<0.000000e+00> : vector<8x8xf32>
    %68 = tpu.matmul %67, %50, %cst_21 {dimension_numbers = #tpu.dot_dimension_numbers<[1], [0], [0], [1], [0, 0, 1, 1], [], []>} : vector<8x8xf32>, vector<8x8xf32>, vector<8x8xf32> -> vector<8x8xf32>
    %69 = vector.extract_strided_slice %1 {offsets = [0, 24], sizes = [8, 8], strides = [1, 1]} : vector<8x96xf32> to vector<8x8xf32>
    %70 = vector.extract_strided_slice %1 {offsets = [0, 56], sizes = [8, 8], strides = [1, 1]} : vector<8x96xf32> to vector<8x8xf32>
    %71 = vector.extract_strided_slice %1 {offsets = [0, 88], sizes = [8, 8], strides = [1, 1]} : vector<8x96xf32> to vector<8x8xf32>
    %cst_22 = arith.constant dense<0.000000e+00> : vector<8x8xf32>
    %72 = tpu.matmul %69, %70, %cst_22 {dimension_numbers = #tpu.dot_dimension_numbers<[1], [1], [0], [0], [0, 0, 1, 0], [], []>} : vector<8x8xf32>, vector<8x8xf32>, vector<8x8xf32> -> vector<8x8xf32>
    %cst_23 = arith.constant 0.353553385 : f32
    %73 = vector.broadcast %cst_23 : f32 to vector<8x8xf32>
    %74 = arith.mulf %72, %73 : vector<8x8xf32>
    %cst_24 = arith.constant -1.000000e+09 : f32
    %75 = vector.shape_cast %5 : vector<1x8xi1> to vector<1x8xi1>
    %76 = vector.broadcast %75 : vector<1x8xi1> to vector<8x8xi1>
    %77 = vector.broadcast %cst_24 : f32 to vector<8x8xf32>
    %78 = arith.select %76, %74, %77 : vector<8x8xi1>, vector<8x8xf32>
    %cst_25 = arith.constant dense<0xFF800000> : vector<8xf32>
    %79 = vector.multi_reduction <maximumf>, %78, %cst_25 [1] : vector<8x8xf32> to vector<8xf32>
    %80 = vector.shape_cast %79 : vector<8xf32> to vector<8x1xf32>
    %81 = vector.broadcast %80 : vector<8x1xf32> to vector<8x8xf32>
    %82 = arith.subf %78, %81 : vector<8x8xf32>
    %83 = math.exp %82 : vector<8x8xf32>
    %cst_26 = arith.constant dense<0.000000e+00> : vector<8xf32>
    %84 = vector.multi_reduction <add>, %83, %cst_26 [1] : vector<8x8xf32> to vector<8xf32>
    %85 = vector.shape_cast %84 : vector<8xf32> to vector<8x1xf32>
    %86 = tpu.reciprocal %85 {approx = true} : vector<8x1xf32> -> vector<8x1xf32>
    %87 = vector.broadcast %86 : vector<8x1xf32> to vector<8x8xf32>
    %88 = arith.mulf %83, %87 : vector<8x8xf32>
    %cst_27 = arith.constant dense<0.000000e+00> : vector<8x8xf32>
    %89 = tpu.matmul %88, %71, %cst_27 {dimension_numbers = #tpu.dot_dimension_numbers<[1], [0], [0], [1], [0, 0, 1, 1], [], []>} : vector<8x8xf32>, vector<8x8xf32>, vector<8x8xf32> -> vector<8x8xf32>
    %90 = tpu.concatenate %26, %47, %68, %89 in 1 : vector<8x8xf32>, vector<8x8xf32>, vector<8x8xf32>, vector<8x8xf32> -> vector<8x32xf32>
    %c0_28 = arith.constant 0 : index
    %c0_29 = arith.constant 0 : index
    %c0_30 = arith.constant 0 : index
    %91 = vector.load %arg3[%c0_28, %c0_29, %c0_30] : memref<1x8x32xf32, #tpu.memory_space<vmem>>, vector<1x8x32xf32>
    %92 = vector.shape_cast %91 : vector<1x8x32xf32> to vector<8x32xf32>
    %93 = vector.shape_cast %90 : vector<8x32xf32> to vector<1x8x32xf32>
    tpu.vector_store %arg3[%c0_28, %c0_29, %c0_30], %93 {strides = array<i32>} : memref<1x8x32xf32, #tpu.memory_space<vmem>>, vector<1x8x32xf32>,
    return
  }
  func.func @transform_0(%arg0: i32) -> (i32, i32, i32) {
    %c0_i32 = arith.constant 0 : i32
    %c0_i32_0 = arith.constant 0 : i32
    %c0_i32_1 = arith.constant 0 : i32
    return %arg0, %c0_i32, %c0_i32_0 : i32, i32, i32
  }
  func.func @transform_1(%arg0: i32) -> (i32, i32, i32) {
    %c0_i32 = arith.constant 0 : i32
    %c0_i32_0 = arith.constant 0 : i32
    %c0_i32_1 = arith.constant 0 : i32
    return %arg0, %c0_i32, %c0_i32_0 : i32, i32, i32
  }
  func.func @transform_2(%arg0: i32) -> (i32, i32, i32) {
    %c0_i32 = arith.constant 0 : i32
    %c0_i32_0 = arith.constant 0 : i32
    %c0_i32_1 = arith.constant 0 : i32
    return %arg0, %c0_i32, %c0_i32_0 : i32, i32, i32
  }
}

module attributes {stable_mosaic.version = 11 : i64} {
  func.func @_linear_kernel(%arg0: i32, %arg1: i32, %arg2: memref<16x32xf32, #tpu.memory_space<vmem>>, %arg3: memref<1x32xf32, #tpu.memory_space<vmem>>, %arg4: memref<1x32xf32, #tpu.memory_space<vmem>>, %arg5: memref<32x128xf32, #tpu.memory_space<vmem>>, %arg6: memref<1x128xf32, #tpu.memory_space<vmem>>, %arg7: memref<16x128xf32, #tpu.memory_space<vmem>>) attributes {dimension_semantics = [#tpu.dimension_semantics<parallel>, #tpu.dimension_semantics<parallel>], iteration_bounds = array<i64: 1, 1>, scalar_prefetch = 0 : i64, scratch_operands = 0 : i64, tpu.core_type = #tpu.core_type<tc>, window_params = [{transform_indices = @transform_0, window_bounds = array<i64: 16, 32>}, {pipeline_mode = #tpu.pipeline_mode<synchronous>, transform_indices = @transform_1, window_bounds = array<i64: 1, 32>}, {pipeline_mode = #tpu.pipeline_mode<synchronous>, transform_indices = @transform_2, window_bounds = array<i64: 1, 32>}, {transform_indices = @transform_3, window_bounds = array<i64: 32, 128>}, {transform_indices = @transform_4, window_bounds = array<i64: 1, 128>}, {transform_indices = @transform_5, window_bounds = array<i64: 16, 128>}]} {
    %c0 = arith.constant 0 : index
    %c0_0 = arith.constant 0 : index
    %0 = vector.load %arg2[%c0, %c0_0] : memref<16x32xf32, #tpu.memory_space<vmem>>, vector<16x32xf32>
    %cst = arith.constant dense<0.000000e+00> : vector<16xf32>
    %1 = vector.multi_reduction <add>, %0, %cst [1] : vector<16x32xf32> to vector<16xf32>
    %2 = vector.shape_cast %1 : vector<16xf32> to vector<16x1xf32>
    %cst_1 = arith.constant 3.200000e+01 : f32
    %3 = vector.broadcast %cst_1 : f32 to vector<16x1xf32>
    %4 = arith.divf %2, %3 : vector<16x1xf32>
    %5 = vector.broadcast %4 : vector<16x1xf32> to vector<16x32xf32>
    %6 = arith.subf %0, %5 : vector<16x32xf32>
    %7 = arith.mulf %6, %6 : vector<16x32xf32>
    %cst_2 = arith.constant dense<0.000000e+00> : vector<16xf32>
    %8 = vector.multi_reduction <add>, %7, %cst_2 [1] : vector<16x32xf32> to vector<16xf32>
    %9 = vector.shape_cast %8 : vector<16xf32> to vector<16x1xf32>
    %cst_3 = arith.constant 3.100000e+01 : f32
    %10 = vector.broadcast %cst_3 : f32 to vector<16x1xf32>
    %11 = arith.divf %9, %10 : vector<16x1xf32>
    %c0_4 = arith.constant 0 : index
    %c0_5 = arith.constant 0 : index
    %12 = vector.load %arg3[%c0_4, %c0_5] : memref<1x32xf32, #tpu.memory_space<vmem>>, vector<1x32xf32>
    %13 = vector.broadcast %12 : vector<1x32xf32> to vector<16x32xf32>
    %14 = arith.mulf %13, %6 : vector<16x32xf32>
    %15 = math.sqrt %11 : vector<16x1xf32>
    %cst_6 = arith.constant 9.99999997E-7 : f32
    %16 = vector.broadcast %cst_6 : f32 to vector<16x1xf32>
    %17 = arith.addf %15, %16 : vector<16x1xf32>
    %18 = vector.broadcast %17 : vector<16x1xf32> to vector<16x32xf32>
    %19 = arith.divf %14, %18 : vector<16x32xf32>
    %c0_7 = arith.constant 0 : index
    %c0_8 = arith.constant 0 : index
    %20 = vector.load %arg4[%c0_7, %c0_8] : memref<1x32xf32, #tpu.memory_space<vmem>>, vector<1x32xf32>
    %21 = vector.broadcast %20 : vector<1x32xf32> to vector<16x32xf32>
    %22 = arith.addf %19, %21 : vector<16x32xf32>
    %c0_9 = arith.constant 0 : index
    %c0_10 = arith.constant 0 : index
    %23 = vector.load %arg5[%c0_9, %c0_10] : memref<32x128xf32, #tpu.memory_space<vmem>>, vector<32x128xf32>
    %cst_11 = arith.constant dense<0.000000e+00> : vector<16x128xf32>
    %24 = tpu.matmul %22, %23, %cst_11 {dimension_numbers = #tpu.dot_dimension_numbers<[1], [0], [0], [1], [0, 0, 1, 1], [], []>} : vector<16x32xf32>, vector<32x128xf32>, vector<16x128xf32> -> vector<16x128xf32>
    %c0_12 = arith.constant 0 : index
    %c0_13 = arith.constant 0 : index
    %25 = vector.load %arg6[%c0_12, %c0_13] : memref<1x128xf32, #tpu.memory_space<vmem>>, vector<1x128xf32>
    %26 = vector.broadcast %25 : vector<1x128xf32> to vector<16x128xf32>
    %27 = arith.addf %24, %26 : vector<16x128xf32>
    %cst_14 = arith.constant 5.000000e-01 : f32
    %28 = vector.broadcast %cst_14 : f32 to vector<16x128xf32>
    %29 = arith.mulf %28, %27 : vector<16x128xf32>
    %cst_15 = arith.constant 4.471500e-02 : f32
    %30 = vector.broadcast %cst_15 : f32 to vector<16x128xf32>
    %31 = arith.mulf %30, %27 : vector<16x128xf32>
    %32 = arith.mulf %31, %27 : vector<16x128xf32>
    %33 = arith.mulf %32, %27 : vector<16x128xf32>
    %34 = arith.addf %27, %33 : vector<16x128xf32>
    %cst_16 = arith.constant 0.797884583 : f32
    %35 = vector.broadcast %cst_16 : f32 to vector<16x128xf32>
    %36 = arith.mulf %35, %34 : vector<16x128xf32>
    %37 = math.tanh %36 : vector<16x128xf32>
    %cst_17 = arith.constant 1.000000e+00 : f32
    %38 = vector.broadcast %cst_17 : f32 to vector<16x128xf32>
    %39 = arith.addf %38, %37 : vector<16x128xf32>
    %40 = arith.mulf %29, %39 : vector<16x128xf32>
    %c0_18 = arith.constant 0 : index
    %c0_19 = arith.constant 0 : index
    %41 = vector.load %arg7[%c0_18, %c0_19] : memref<16x128xf32, #tpu.memory_space<vmem>>, vector<16x128xf32>
    tpu.vector_store %arg7[%c0_18, %c0_19], %40 {strides = array<i32>} : memref<16x128xf32, #tpu.memory_space<vmem>>, vector<16x128xf32>,
    return
  }
  func.func @transform_0(%arg0: i32, %arg1: i32) -> (i32, i32) {
    %c0_i32 = arith.constant 0 : i32
    %c0_i32_0 = arith.constant 0 : i32
    return %arg0, %c0_i32 : i32, i32
  }
  func.func @transform_1(%arg0: i32, %arg1: i32) -> (i32, i32) {
    %c0_i32 = arith.constant 0 : i32
    %c0_i32_0 = arith.constant 0 : i32
    %c0_i32_1 = arith.constant 0 : i32
    return %c0_i32, %c0_i32_0 : i32, i32
  }
  func.func @transform_2(%arg0: i32, %arg1: i32) -> (i32, i32) {
    %c0_i32 = arith.constant 0 : i32
    %c0_i32_0 = arith.constant 0 : i32
    %c0_i32_1 = arith.constant 0 : i32
    return %c0_i32, %c0_i32_0 : i32, i32
  }
  func.func @transform_3(%arg0: i32, %arg1: i32) -> (i32, i32) {
    %c0_i32 = arith.constant 0 : i32
    %c0_i32_0 = arith.constant 0 : i32
    return %c0_i32, %arg1 : i32, i32
  }
  func.func @transform_4(%arg0: i32, %arg1: i32) -> (i32, i32) {
    %c0_i32 = arith.constant 0 : i32
    %c0_i32_0 = arith.constant 0 : i32
    return %c0_i32, %arg1 : i32, i32
  }
  func.func @transform_5(%arg0: i32, %arg1: i32) -> (i32, i32) {
    %c0_i32 = arith.constant 0 : i32
    return %arg0, %arg1 : i32, i32
  }
}

module attributes {stable_mosaic.version = 11 : i64} {
  func.func @_linear_kernel(%arg0: i32, %arg1: i32, %arg2: memref<16x128xf32, #tpu.memory_space<vmem>>, %arg3: memref<128x32xf32, #tpu.memory_space<vmem>>, %arg4: memref<1x32xf32, #tpu.memory_space<vmem>>, %arg5: memref<16x32xf32, #tpu.memory_space<vmem>>, %arg6: memref<16x32xf32, #tpu.memory_space<vmem>>) attributes {dimension_semantics = [#tpu.dimension_semantics<parallel>, #tpu.dimension_semantics<parallel>], iteration_bounds = array<i64: 1, 1>, scalar_prefetch = 0 : i64, scratch_operands = 0 : i64, tpu.core_type = #tpu.core_type<tc>, window_params = [{transform_indices = @transform_0, window_bounds = array<i64: 16, 128>}, {transform_indices = @transform_1, window_bounds = array<i64: 128, 32>}, {transform_indices = @transform_2, window_bounds = array<i64: 1, 32>}, {transform_indices = @transform_3, window_bounds = array<i64: 16, 32>}, {transform_indices = @transform_4, window_bounds = array<i64: 16, 32>}]} {
    %c0 = arith.constant 0 : index
    %c0_0 = arith.constant 0 : index
    %0 = vector.load %arg2[%c0, %c0_0] : memref<16x128xf32, #tpu.memory_space<vmem>>, vector<16x128xf32>
    %c0_1 = arith.constant 0 : index
    %c0_2 = arith.constant 0 : index
    %1 = vector.load %arg3[%c0_1, %c0_2] : memref<128x32xf32, #tpu.memory_space<vmem>>, vector<128x32xf32>
    %cst = arith.constant dense<0.000000e+00> : vector<16x32xf32>
    %2 = tpu.matmul %0, %1, %cst {dimension_numbers = #tpu.dot_dimension_numbers<[1], [0], [0], [1], [0, 0, 1, 1], [], []>} : vector<16x128xf32>, vector<128x32xf32>, vector<16x32xf32> -> vector<16x32xf32>
    %c0_3 = arith.constant 0 : index
    %c0_4 = arith.constant 0 : index
    %3 = vector.load %arg4[%c0_3, %c0_4] : memref<1x32xf32, #tpu.memory_space<vmem>>, vector<1x32xf32>
    %4 = vector.broadcast %3 : vector<1x32xf32> to vector<16x32xf32>
    %5 = arith.addf %2, %4 : vector<16x32xf32>
    %c0_5 = arith.constant 0 : index
    %c0_6 = arith.constant 0 : index
    %6 = vector.load %arg5[%c0_5, %c0_6] : memref<16x32xf32, #tpu.memory_space<vmem>>, vector<16x32xf32>
    %7 = arith.addf %5, %6 : vector<16x32xf32>
    %c0_7 = arith.constant 0 : index
    %c0_8 = arith.constant 0 : index
    %8 = vector.load %arg6[%c0_7, %c0_8] : memref<16x32xf32, #tpu.memory_space<vmem>>, vector<16x32xf32>
    tpu.vector_store %arg6[%c0_7, %c0_8], %7 {strides = array<i32>} : memref<16x32xf32, #tpu.memory_space<vmem>>, vector<16x32xf32>,
    return
  }
  func.func @transform_0(%arg0: i32, %arg1: i32) -> (i32, i32) {
    %c0_i32 = arith.constant 0 : i32
    %c0_i32_0 = arith.constant 0 : i32
    return %arg0, %c0_i32 : i32, i32
  }
  func.func @transform_1(%arg0: i32, %arg1: i32) -> (i32, i32) {
    %c0_i32 = arith.constant 0 : i32
    %c0_i32_0 = arith.constant 0 : i32
    return %c0_i32, %arg1 : i32, i32
  }
  func.func @transform_2(%arg0: i32, %arg1: i32) -> (i32, i32) {
    %c0_i32 = arith.constant 0 : i32
    %c0_i32_0 = arith.constant 0 : i32
    return %c0_i32, %arg1 : i32, i32
  }
  func.func @transform_3(%arg0: i32, %arg1: i32) -> (i32, i32) {
    %c0_i32 = arith.constant 0 : i32
    return %arg0, %arg1 : i32, i32
  }
  func.func @transform_4(%arg0: i32, %arg1: i32) -> (i32, i32) {
    %c0_i32 = arith.constant 0 : i32
    return %arg0, %arg1 : i32, i32
  }
}

module attributes {stable_mosaic.version = 11 : i64} {
  func.func @_linear_kernel(%arg0: i32, %arg1: i32, %arg2: memref<16x128xf32, #tpu.memory_space<vmem>>, %arg3: memref<128x32xf32, #tpu.memory_space<vmem>>, %arg4: memref<1x32xf32, #tpu.memory_space<vmem>>, %arg5: memref<16x32xf32, #tpu.memory_space<vmem>>, %arg6: memref<16x32xf32, #tpu.memory_space<vmem>>) attributes {dimension_semantics = [#tpu.dimension_semantics<parallel>, #tpu.dimension_semantics<parallel>], iteration_bounds = array<i64: 1, 1>, scalar_prefetch = 0 : i64, scratch_operands = 0 : i64, tpu.core_type = #tpu.core_type<tc>, window_params = [{transform_indices = @transform_0, window_bounds = array<i64: 16, 128>}, {transform_indices = @transform_1, window_bounds = array<i64: 128, 32>}, {transform_indices = @transform_2, window_bounds = array<i64: 1, 32>}, {transform_indices = @transform_3, window_bounds = array<i64: 16, 32>}, {transform_indices = @transform_4, window_bounds = array<i64: 16, 32>}]} {
    %c0 = arith.constant 0 : index
    %c0_0 = arith.constant 0 : index
    %0 = vector.load %arg2[%c0, %c0_0] : memref<16x128xf32, #tpu.memory_space<vmem>>, vector<16x128xf32>
    %c0_1 = arith.constant 0 : index
    %c0_2 = arith.constant 0 : index
    %1 = vector.load %arg3[%c0_1, %c0_2] : memref<128x32xf32, #tpu.memory_space<vmem>>, vector<128x32xf32>
    %cst = arith.constant dense<0.000000e+00> : vector<16x32xf32>
    %2 = tpu.matmul %0, %1, %cst {dimension_numbers = #tpu.dot_dimension_numbers<[1], [0], [0], [1], [0, 0, 1, 1], [], []>} : vector<16x128xf32>, vector<128x32xf32>, vector<16x32xf32> -> vector<16x32xf32>
    %c0_3 = arith.constant 0 : index
    %c0_4 = arith.constant 0 : index
    %3 = vector.load %arg4[%c0_3, %c0_4] : memref<1x32xf32, #tpu.memory_space<vmem>>, vector<1x32xf32>
    %4 = vector.broadcast %3 : vector<1x32xf32> to vector<16x32xf32>
    %5 = arith.addf %2, %4 : vector<16x32xf32>
    %c0_5 = arith.constant 0 : index
    %c0_6 = arith.constant 0 : index
    %6 = vector.load %arg5[%c0_5, %c0_6] : memref<16x32xf32, #tpu.memory_space<vmem>>, vector<16x32xf32>
    %7 = arith.addf %5, %6 : vector<16x32xf32>
    %c0_7 = arith.constant 0 : index
    %c0_8 = arith.constant 0 : index
    %8 = vector.load %arg6[%c0_7, %c0_8] : memref<16x32xf32, #tpu.memory_space<vmem>>, vector<16x32xf32>
    tpu.vector_store %arg6[%c0_7, %c0_8], %7 {strides = array<i32>} : memref<16x32xf32, #tpu.memory_space<vmem>>, vector<16x32xf32>,
    return
  }
  func.func @transform_0(%arg0: i32, %arg1: i32) -> (i32, i32) {
    %c0_i32 = arith.constant 0 : i32
    %c0_i32_0 = arith.constant 0 : i32
    return %arg0, %c0_i32 : i32, i32
  }
  func.func @transform_1(%arg0: i32, %arg1: i32) -> (i32, i32) {
    %c0_i32 = arith.constant 0 : i32
    %c0_i32_0 = arith.constant 0 : i32
    return %c0_i32, %arg1 : i32, i32
  }
  func.func @transform_2(%arg0: i32, %arg1: i32) -> (i32, i32) {
    %c0_i32 = arith.constant 0 : i32
    %c0_i32_0 = arith.constant 0 : i32
    return %c0_i32, %arg1 : i32, i32
  }
  func.func @transform_3(%arg0: i32, %arg1: i32) -> (i32, i32) {
    %c0_i32 = arith.constant 0 : i32
    return %arg0, %arg1 : i32, i32
  }
  func.func @transform_4(%arg0: i32, %arg1: i32) -> (i32, i32) {
    %c0_i32 = arith.constant 0 : i32
    return %arg0, %arg1 : i32, i32
  }
}

</mosaic_0001>

<bundles_post_ra>
// kernel: bert_forward.14
= control target key start
LH: loop header
LB: loop body
LE: loop exit
PB: predicated region body
PF: predicated region fallthrough
CT: control target
= control target key end

     0   :  { %vm30_vm0 = vcmask 261120   ;;  %s212_s1 = inlined_call_operand.vmem [shape: f32[32,32], index: 1, kind: input, shape index: {}]   ;;  %s213_s0 = inlined_call_operand.vmem [shape: f32[16,32], index: 0, kind: input, shape index: {}]   ;;  %s214_s2 = inlined_call_operand.vmem [shape: f32[1,32], index: 2, kind: input, shape index: {}]   ;;  %s215_s3 = inlined_call_operand.vmem [shape: f32[16,32], index: 3, kind: input, shape index: {}]   ;;  %s216_s4 = inlined_call_operand.vmem [shape: f32[16,32], index: 4, kind: output, shape index: {}]  }
   0x1   :  { %v19_v0 = vld [vmem:[%s212_s1] sm:$0xff]  ;;  %v20_v1 = vld [vmem:[%s212_s1 + $0x8] sm:$0xff]  ;;  %v21_v2 = vld [vmem:[%s212_s1 + $0x10] sm:$0xff] }
   0x2   :  { %v142_v3 = vpack.c.bf16 %v20_v1, %v19_v0  ;;  %v22_v4 = vld [vmem:[%s212_s1 + $0x18] sm:$0xff]  ;;  %v17_v5 = vld [vmem:[%s213_s0] sm:$0xff]  ;;  %v18_v7 = vld [vmem:[%s213_s0 + $0x8] sm:$0xff] }
   0x3   :  { %v146_v6 = vpack.c.bf16 %v22_v4, %v21_v2  ;;  %139 = vmatprep.mubr.msk.f32.mxu0 %vm30_vm0, %v17_v5  ;;  %v122_v8 = vld [vmem:[%s214_s2] ss:$0 sm:$0xff]  ;;  %v113_v10 = vld [vmem:[%s215_s3 + $0x8] sm:$0xff] }
   0x4   :  { %143 = vmatprep.subr.bf16.mxu0 %v142_v3  ;;  %v112_v13 = vld [vmem:[%s215_s3] sm:$0xff] }
   0x5   :  { %145 = vmatpush3.bf16.msra.mxu0 %v142_v3 }
   0x6   :  { %147 = vmatprep.subr.bf16.mxu0 %v146_v6 }
   0x9   :  { %149 = vmatpush3.bf16.msra.mxu0 %v146_v6 }
   0xc   :  { %140 = vmatmul.mubr.msk.f32.vlgmr.msra.gmra.mrb[0].mxu0 %vm30_vm0, %v18_v7 }
  0xdf   :  { %v141_v9 = vpop.f32.mrb[0].mxu0 }
  0xe0   :  { %v109_v11 = vadd.f32 %v141_v9, %v122_v8  ;;  %v103_v12 = vpop.f32.mrb[1].mxu0 }
  0xe1   :  { %v104_v14 = vadd.f32 %v122_v8, %v103_v12 }
  0xe2   :  { %v115_v15 = vadd.f32 %v113_v10, %v109_v11 }
  0xe3   :  { %v114_v16 = vadd.f32 %v112_v13, %v104_v14 }
  0xe4   :  { %117 = vst.msk [vmem:[%s216_s4 + $0x8] sm:$0xff] %vm30_vm0, %v115_v15 }
  0xe5   :  { %116 = vst.msk [vmem:[%s216_s4] sm:$0xff] %vm30_vm0, %v114_v16 }

// kernel: bert_forward.11
= control target key start
LH: loop header
LB: loop body
LE: loop exit
PB: predicated region body
PF: predicated region fallthrough
CT: control target
= control target key end

     0   :  { %vm16_vm0 = vcmask 261120   ;;  %s137_s0 = inlined_call_operand.vmem [shape: f32[16,32], index: 0, kind: input, shape index: {}]   ;;  %s138_s1 = inlined_call_operand.vmem [shape: f32[1,32], index: 1, kind: input, shape index: {}]   ;;  %s139_s2 = inlined_call_operand.vmem [shape: f32[1,32], index: 2, kind: input, shape index: {}]   ;;  %s140_s3 = inlined_call_operand.vmem [shape: f32[16,32], index: 3, kind: output, shape index: {}]  }
   0x1   :  { %v14_v0 = vld [vmem:[%s137_s0] sm:$0xff]  ;;  %v15_v1 = vld [vmem:[%s137_s0 + $0x8] sm:$0xff] }
   0x2   :  { %v17_v2 = vsel %vm16_vm0, %v14_v0, 0.0  ;;  %v20_v3 = vsel %vm16_vm0, %v15_v1, 0.0  ;;  %v83_v30 = vld [vmem:[%s138_s1] ss:$0 sm:$0xff] }
   0x3   :  { %18 = vadd.xlane.f32.xlu0 %v17_v2  ;;  %v84_v33 = vld [vmem:[%s139_s2] ss:$0 sm:$0xff] }
   0x7   :  { %21 = vadd.xlane.f32.xlu0 %v20_v3 }
  0x90   :  { %v19_v4 = vpop.xlane.xlu0 %18 }
  0x91   :  { %v24_v5 = vmul.f32 0.03125, %v19_v4 }
  0x93   :  { %v26_v6 = vsub.f32 %v14_v0, %v24_v5 }
  0x94   :  { %v22_v7 = vpop.xlane.xlu0 %21 }
  0x95   :  { %v25_v8 = vmul.f32 0.03125, %v22_v7  ;;  %v28_v9 = vmul.f32 %v26_v6, %v26_v6  ;;  %v46_v31 = vmul.f32 %v83_v30, %v26_v6 }
  0x97   :  { %v27_v10 = vsub.f32 %v15_v1, %v25_v8  ;;  %v30_v11 = vsel %vm16_vm0, %v28_v9, 0.0 }
  0x98   :  { %31 = vadd.xlane.f32.xlu1 %v30_v11 }
  0x99   :  { %v29_v12 = vmul.f32 %v27_v10, %v27_v10  ;;  %v47_v35 = vmul.f32 %v83_v30, %v27_v10 }
  0x9b   :  { %v33_v13 = vsel %vm16_vm0, %v29_v12, 0.0 }
  0x9c   :  { %34 = vadd.xlane.f32.xlu1 %v33_v13 }
 0x125   :  { %v32_v14 = vpop.xlane.xlu1 %31 }
 0x126   :  { %v37_v15 = vmul.f32 0.032258064, %v32_v14 }
 0x128   :  { %85 = vrsqrt.f32 %v37_v15  ;;  %vm50_vm1 = vcmp.eq.f32.partialorder %v37_v15, inf  ;;  %v53_v20 = vand.u32 2147483648, %v37_v15  ;;  %vm52_vm2 = vcmp.eq.f32.partialorder %v37_v15, 0.0 }
 0x129   :  { %v35_v16 = vpop.xlane.xlu1 %34 }
 0x12a   :  { %v38_v17 = vmul.f32 0.032258064, %v35_v16 }
 0x12c   :  { %87 = vrsqrt.f32 %v38_v17  ;;  %vm57_vm3 = vcmp.eq.f32.partialorder %v38_v17, inf  ;;  %v60_v26 = vand.u32 2147483648, %v38_v17  ;;  %vm59_vm4 = vcmp.eq.f32.partialorder %v38_v17, 0.0 }
 0x132   :  { %v86_v18 = vpop.eup %85 }
 0x133   :  { %v49_v19 = vmul.f32 %v86_v18, %v37_v15 }
 0x135   :  { %v51_v21 = vsel %vm50_vm1, %v37_v15, %v49_v19 }
 0x136   :  { %v88_v22 = vpop.eup %87  ;;  %v54_v23 = vsel %vm52_vm2, %v53_v20, %v51_v21 }
 0x137   :  { %v62_v24 = vadd.f32 1e-06, %v54_v23  ;;  %v56_v25 = vmul.f32 %v88_v22, %v38_v17 }
 0x139   :  { %89 = vrcp.f32 %v62_v24  ;;  %v58_v27 = vsel %vm57_vm3, %v38_v17, %v56_v25 }
 0x13a   :  { %v61_v28 = vsel %vm59_vm4, %v60_v26, %v58_v27 }
 0x13b   :  { %v63_v29 = vadd.f32 1e-06, %v61_v28 }
 0x13d   :  { %91 = vrcp.f32 %v63_v29 }
 0x143   :  { %v90_v32 = vpop.eup %89 }
 0x144   :  { %v65_v34 = vmul.f32 %v90_v32, %v46_v31 }
 0x146   :  { %v75_v36 = vadd.f32 %v84_v33, %v65_v34 }
 0x147   :  { %v92_v37 = vpop.eup %91 }
 0x148   :  { %77 = vst.msk [vmem:[%s140_s3] sm:$0xff] %vm16_vm0, %v75_v36  ;;  %v67_v38 = vmul.f32 %v92_v37, %v47_v35 }
 0x14a   :  { %v76_v39 = vadd.f32 %v84_v33, %v67_v38 }
 0x14c   :  { %78 = vst.msk [vmem:[%s140_s3 + $0x8] sm:$0xff] %vm16_vm0, %v76_v39 }

// kernel: bert_forward.12
= control target key start
LH: loop header
LB: loop body
LE: loop exit
PB: predicated region body
PF: predicated region fallthrough
CT: control target
= control target key end

     0   :  { %vm22_vm0 = vcmask 261120   ;;  %vm175_vm5 = vcmask 785408   ;;  %s289_s0 = inlined_call_operand.vmem [shape: f32[16,32], index: 0, kind: input, shape index: {}]   ;;  %s290_s3 = inlined_call_operand.vmem [shape: f32[32,96], index: 3, kind: input, shape index: {}]   ;;  %s291_s1 = inlined_call_operand.vmem [shape: f32[1,32], index: 1, kind: input, shape index: {}]   ;;  %s292_s2 = inlined_call_operand.vmem [shape: f32[1,32], index: 2, kind: input, shape index: {}]   ;;  %s293_s4 = inlined_call_operand.vmem [shape: f32[1,96], index: 4, kind: input, shape index: {}]   ;;  %s294_s5 = inlined_call_operand.vmem [shape: f32[16,96], index: 5, kind: output, shape index: {}]  }
   0x1   :  { %v20_v0 = vld [vmem:[%s289_s0] sm:$0xff]  ;;  %v21_v1 = vld [vmem:[%s289_s0 + $0x8] sm:$0xff]  ;;  %v85_v16 = vld [vmem:[%s290_s3 + $0x10] sm:$0xff] }
   0x2   :  { %v23_v2 = vsel %vm22_vm0, %v20_v0, 0.0  ;;  %v26_v3 = vsel %vm22_vm0, %v21_v1, 0.0  ;;  %v83_v14 = vld [vmem:[%s290_s3] sm:$0xff]  ;;  %v84_v15 = vld [vmem:[%s290_s3 + $0x8] sm:$0xff]  ;;  %v86_v18 = vld [vmem:[%s290_s3 + $0x18] sm:$0xff] }
   0x3   :  { %24 = vadd.xlane.f32.xlu0 %v23_v2  ;;  %v204_v17 = vpack.c.bf16 %v84_v15, %v83_v14  ;;  %v208_v19 = vpack.c.bf16 %v86_v18, %v85_v16  ;;  %v182_v36 = vld [vmem:[%s291_s1] ss:$0 sm:$0xff] }
   0x4   :  { %v183_v39 = vld [vmem:[%s292_s2] ss:$0 sm:$0xff] }
   0x5   :  { %205 = vmatprep.subr.bf16.mxu0 %v204_v17  ;;  %v184_v46 = vld [vmem:[%s293_s4] ss:$0 sm:$0xff] }
   0x6   :  { %207 = vmatpush3.bf16.msra.mxu0 %v204_v17 }
   0x7   :  { %27 = vadd.xlane.f32.xlu0 %v26_v3  ;;  %209 = vmatprep.subr.bf16.mxu0 %v208_v19 }
   0xa   :  { %211 = vmatpush3.bf16.msra.mxu0 %v208_v19 }
  0x90   :  { %v25_v4 = vpop.xlane.xlu0 %24 }
  0x91   :  { %v30_v5 = vmul.f32 0.03125, %v25_v4 }
  0x93   :  { %v32_v6 = vsub.f32 %v20_v0, %v30_v5 }
  0x94   :  { %v28_v7 = vpop.xlane.xlu0 %27 }
  0x95   :  { %v31_v8 = vmul.f32 0.03125, %v28_v7  ;;  %v34_v9 = vmul.f32 %v32_v6, %v32_v6  ;;  %v52_v37 = vmul.f32 %v182_v36, %v32_v6 }
  0x97   :  { %v33_v10 = vsub.f32 %v21_v1, %v31_v8  ;;  %v36_v11 = vsel %vm22_vm0, %v34_v9, 0.0 }
  0x98   :  { %37 = vadd.xlane.f32.xlu1 %v36_v11 }
  0x99   :  { %v35_v12 = vmul.f32 %v33_v10, %v33_v10  ;;  %v53_v41 = vmul.f32 %v182_v36, %v33_v10 }
  0x9b   :  { %v39_v13 = vsel %vm22_vm0, %v35_v12, 0.0 }
  0x9c   :  { %40 = vadd.xlane.f32.xlu1 %v39_v13 }
 0x125   :  { %v38_v20 = vpop.xlane.xlu1 %37 }
 0x126   :  { %v43_v21 = vmul.f32 0.032258064, %v38_v20 }
 0x128   :  { %212 = vrsqrt.f32 %v43_v21  ;;  %vm56_vm1 = vcmp.eq.f32.partialorder %v43_v21, inf  ;;  %v59_v26 = vand.u32 2147483648, %v43_v21  ;;  %vm58_vm2 = vcmp.eq.f32.partialorder %v43_v21, 0.0 }
 0x129   :  { %v41_v22 = vpop.xlane.xlu1 %40 }
 0x12a   :  { %v44_v23 = vmul.f32 0.032258064, %v41_v22 }
 0x12c   :  { %214 = vrsqrt.f32 %v44_v23  ;;  %vm63_vm3 = vcmp.eq.f32.partialorder %v44_v23, inf  ;;  %v66_v32 = vand.u32 2147483648, %v44_v23  ;;  %vm65_vm4 = vcmp.eq.f32.partialorder %v44_v23, 0.0 }
 0x132   :  { %v213_v24 = vpop.eup %212 }
 0x133   :  { %v55_v25 = vmul.f32 %v213_v24, %v43_v21 }
 0x135   :  { %v57_v27 = vsel %vm56_vm1, %v43_v21, %v55_v25 }
 0x136   :  { %v215_v28 = vpop.eup %214  ;;  %v60_v29 = vsel %vm58_vm2, %v59_v26, %v57_v27 }
 0x137   :  { %v62_v30 = vmul.f32 %v215_v28, %v44_v23  ;;  %v68_v31 = vadd.f32 1e-06, %v60_v29 }
 0x139   :  { %v64_v33 = vsel %vm63_vm3, %v44_v23, %v62_v30  ;;  %216 = vrcp.f32 %v68_v31 }
 0x13a   :  { %v67_v34 = vsel %vm65_vm4, %v66_v32, %v64_v33 }
 0x13b   :  { %v69_v35 = vadd.f32 1e-06, %v67_v34 }
 0x13d   :  { %218 = vrcp.f32 %v69_v35 }
 0x143   :  { %v217_v38 = vpop.eup %216 }
 0x144   :  { %v71_v40 = vmul.f32 %v217_v38, %v52_v37 }
 0x146   :  { %v81_v42 = vadd.f32 %v183_v39, %v71_v40 }
 0x147   :  { %v219_v43 = vpop.eup %218 }
 0x148   :  { %v73_v44 = vmul.f32 %v219_v43, %v53_v41  ;;  %201 = vmatprep.mubr.msk.f32.mxu0 %vm22_vm0, %v81_v42 }
 0x14a   :  { %v82_v45 = vadd.f32 %v183_v39, %v73_v44 }
 0x14c   :  { %202 = vmatmul.mubr.msk.f32.vlgmr.msra.gmra.mrb[0].mxu0 %vm22_vm0, %v82_v45 }
 0x21f   :  { %v203_v47 = vpop.f32.mrb[0].mxu0 }
 0x220   :  { %v172_v48 = vadd.f32 %v203_v47, %v184_v46  ;;  %v166_v49 = vpop.f32.mrb[1].mxu0 }
 0x221   :  { %v167_v50 = vadd.f32 %v184_v46, %v166_v49 }
 0x222   :  { %177 = vst.msk [vmem:[%s294_s5 + $0x8] sm:$0xff] %vm175_vm5, %v172_v48 }
 0x223   :  { %176 = vst.msk [vmem:[%s294_s5] sm:$0xff] %vm175_vm5, %v167_v50 }

// kernel: bert_forward.13
= control target key start
LH: loop header
LB: loop body
LE: loop exit
PB: predicated region body
PF: predicated region fallthrough
CT: control target
= control target key end

     0   :  { %s1069_s9 = smov 0   ;;  %s1170_s0 = inlined_call_operand.vmem [shape: f32[2,8,96], index: 0, kind: input, shape index: {}]   ;;  %s1171_s1 = inlined_call_operand.vmem [shape: s32[2,1,8], index: 1, kind: input, shape index: {}]   ;;  %s1172_s2 = inlined_call_operand.vmem [shape: f32[2,8,32], index: 2, kind: output, shape index: {}]  }
   0x1 LB: > { %s911_s10 = sadd.s32 4294967295, %s1035_s9   ;;  %p915_p0 = scmp.ge.s32.totalorder %s1035_s9, 1  ;;  %s1035_s9 = sphi %s1069_s9, %s12_s9  }
   0x2   : > { %p119_p1 = scmp.lt.s32.totalorder %s1035_s9, 3 }
   0x4   : > { %p120_p2 = pnand %p915_p0, %p119_p1 }
   0x5   : > { %p142_p3 = scmp.lt.s32.totalorder (!%p120_p2), %s911_s10, 1  ;;  %v1037_v0 = vmov (!%p120_p2), 0.0   ;;  %vm1038_vm0 = vmmov (!%p120_p2), 0   ;;  %s1039_s15 = smov (!%p120_p2), 96   ;;  %vm159_vm1 = vcmask (!%p120_p2), 64512   ;;  %v236_v3 = vlaneseq (!%p120_p2) }
   0x6   : > { %123 = sbr.rel (%p120_p2) target bundleno = 1534 (0x5fe), region = 28  ;;  %948 = vmatprep.subr.mxu0 (!%p120_p2), %v1037_v0  ;;  %950 = vmatprep.mubr.msk.f32.mxu0 (!%p120_p2), %vm1038_vm0, %v1037_v0  ;;  %s1040_s16 = smov (!%p120_p2), 64   ;;  %v1044_v7 = vmov (!%p120_p2), 0   ;;  %vm843_vm4 = vcmask (!%p120_p2), 130048   ;;  %vm845_vm5 = vcmask (!%p120_p2), 195584   ;;  %vm847_vm6 = vcmask (!%p120_p2), 261120  }
   0x7   : > { %953 = vmatprep.subr.mxu1 (!%p120_p2), %v1037_v0  ;;  %955 = vmatprep.mubr.msk.f32.mxu1 (!%p120_p2), %vm1038_vm0, %v1037_v0  ;;  %s1041_s17 = smov (!%p120_p2), 88   ;;  %s1042_s18 = smov (!%p120_p2), 120   ;;  %v237_v5 = vshrl.u32 (!%p120_p2), %v236_v3, 7 }
   0x8   : > { %s1043_s19 = smov (!%p120_p2), 80   ;;  %s1045_s23 = smov (!%p120_p2), 72  }
   0x9   : > { %v238_v6 = vsub.s32 (!%p120_p2), 0, %v237_v5  ;;  %s1046_s24 = smov (!%p120_p2), 112   ;;  %s1047_s25 = smov (!%p120_p2), 104  }
   0xa   : > { %s1048_s26 = smov (!%p120_p2), 56   ;;  %s1049_s27 = smov (!%p120_p2), 40  }
   0xb   : > { %s1050_s28 = smov (!%p120_p2), 48   ;;  %s1051_s29 = smov (!%p120_p2), 8  }
   0xc   : > { %s1052_s30 = smov (!%p120_p2), 16   ;;  %s1053_s3 = smov (!%p120_p2), 24  }
   0xd   : > { %s1174_s10 = smov (!%p142_p3, %s911_s10), 1 }
   0xe   : > { %s916_s11 = sshll.u32 %s1174_s10, 3  ;;  %s148_s22 = scalar_lea.vmem %s1171_s1, %s1174_s10 }
   0xf   : > { %s145_s14 = scalar_lea.vmem %s1170_s0, %s916_s11  ;;  %v154_v4 = vld [vmem:[%s148_s22] sm:$0x1]  ;;  %s152_s6 = scalar_lea.vmem %s1172_s2, %s916_s11 }
  0x10   : > { %v1091_v1 = vld [vmem:[%s145_s14] sm:$0xff]  ;;  %vm155_vm2 = vcmp.gt.s32.totalorder %v154_v4, 0 }
  0x11   : > { %157 = vrot.lane.b32.xlu0 %v1091_v1, %s1039_s15  ;;  %253 = vrot.lane.b32.xlu1 %v1091_v1, %s1040_s16  ;;  %v235_v8 = vsel %vm155_vm2, 1, %v1044_v7 }
  0x12   : > { %v1108_v9 = vrot.slane %v235_v8, %v238_v6 }
  0x14   : > { %vm240_vm3 = vcmp.eq.s32.totalorder %v1108_v9, 1 }
  0x15   : > { %331 = vrot.lane.b32.xlu1 %v1091_v1, %s1041_s17 }
  0x19   : > { %329 = vrot.lane.b32.xlu1 %v1091_v1, %s1042_s18 }
  0x1d   : > { %498 = vrot.lane.b32.xlu1 %v1091_v1, %s1043_s19 }
  0x83   : > { %v158_v2 = vpop.permute.xlu0 %157  ;;  %v254_v15 = vpop.permute.xlu1 %253 }
  0x84   : > { %949 = vmatpush3.xpose.msk.msra.mxu0 %vm159_vm1, %v158_v2  ;;  %954 = vmatpush3.msra.mxu1 %v254_v15 }
  0x85   : > { %963 = vmatprep.subr.mxu0 %v1037_v0  ;;  %958 = vmatprep.subr.mxu1 %v1037_v0 }
  0x87   : > { %951 = vmatmul.mubr.msk.f32.vlgmr.msra.gmra.mrb[0].mxu0 %vm159_vm1, %v1091_v1  ;;  %v332_v21 = vpop.permute.xlu1 %331 }
  0x88   : > { %965 = vmatprep.mubr.msk.f32.mxu0 %vm1038_vm0, %v1037_v0 }
  0x8b   : > { %v330_v22 = vpop.permute.xlu1 %329 }
  0x8f   : > { %v499_v23 = vpop.permute.xlu1 %498 }
 0x15a   : > { %v230_v10 = vpop.f32.mrb[0].mxu0 }
 0x15b   : > { %v234_v11 = vmul.f32 0.35355338, %v230_v10  ;;  %v952_v12 = vpop.f32.mrb[1].mxu0 }
 0x15d   : > { %v241_v13 = vsel %vm240_vm3, %v234_v11, -1e+09 }
 0x15e   : > { %v242_v14 = vsel %vm159_vm1, %v241_v13, -inf }
 0x15f   : > { %243 = vmax.xlane.f32.xlu0 %v242_v14 }
 0x175   : > { %665 = vrot.lane.b32.xlu0 %v1091_v1, %s1045_s23 }
 0x1ec   : > { %v244_v16 = vpop.xlane.xlu0 %243 }
 0x1ed   : > { %v245_v17 = vsub.f32 %v241_v13, %v244_v16 }
 0x1ef   : > { %v246_v18 = vmul.f32 1.442695, %v245_v17 }
 0x1f0   : > { %v666_v28 = vpop.permute.xlu0 %665 }
 0x1f1   : > { %1013 = vpow2.f32 %v246_v18 }
 0x1fb   : > { %v1014_v19 = vpop.eup %1013 }
 0x1fc   : > { %v248_v20 = vsel %vm159_vm1, %v1014_v19, 0.0 }
 0x1fd   : > { %249 = vadd.xlane.f32.xlu1 %v248_v20 }
 0x20e   : > { %496 = vrot.lane.b32.xlu1 %v1091_v1, %s1046_s24 }
 0x212   : > { %663 = vrot.lane.b32.xlu1 %v1091_v1, %s1047_s25 }
 0x28a   : > { %v250_v24 = vpop.xlane.xlu1 %249 }
 0x28b   : > { %1015 = vrcp.f32 %v250_v24 }
 0x28e   : > { %v497_v27 = vpop.permute.xlu1 %496 }
 0x292   : > { %v664_v29 = vpop.permute.xlu1 %663 }
 0x295   : > { %v1016_v25 = vpop.eup %1015 }
 0x296   : > { %v252_v26 = vmul.f32 %v1016_v25, %v1014_v19 }
 0x298   : > { %956 = vmatmul.mubr.msk.f32.vlgmr.msra.gmra.mrb[0].mxu1 %vm159_vm1, %v252_v26 }
 0x299   : > { %959 = vmatpush3.xpose.msk.msra.mxu1 %vm159_vm1, %v332_v21  ;;  %960 = vmatprep.mubr.msk.f32.mxu1 %vm1038_vm0, %v1037_v0 }
 0x29a   : > { %968 = vmatprep.subr.mxu1 %v1037_v0 }
 0x29c   : > { %961 = vmatmul.mubr.msk.f32.vlgmr.msra.gmra.mrb[2].mxu1 %vm159_vm1, %v330_v22 }
 0x29d   : > { %969 = vmatpush3.xpose.msk.msra.mxu1 %vm159_vm1, %v499_v23  ;;  %970 = vmatprep.mubr.msk.f32.mxu1 %vm1038_vm0, %v1037_v0 }
 0x29e   : > { %978 = vmatprep.subr.mxu1 %v1037_v0 }
 0x2a0   : > { %971 = vmatmul.mubr.msk.f32.vlgmr.msra.gmra.mrb[4].mxu1 %vm159_vm1, %v497_v27 }
 0x2a1   : > { %979 = vmatpush3.xpose.msk.msra.mxu1 %vm159_vm1, %v666_v28  ;;  %980 = vmatprep.mubr.msk.f32.mxu1 %vm1038_vm0, %v1037_v0 }
 0x2a4   : > { %981 = vmatmul.mubr.msk.f32.vlgmr.msra.gmra.mrb[6].mxu1 %vm159_vm1, %v664_v29 }
 0x36b   : > { %v1134_v30 = vpop.f32.mrb[0].mxu1 }
 0x36c   : > { %v957_v31 = vpop.f32.mrb[1].mxu1 }
 0x36f   : > { %v403_v32 = vpop.f32.mrb[2].mxu1 }
 0x370   : > { %v407_v33 = vmul.f32 0.35355338, %v403_v32  ;;  %v962_v34 = vpop.f32.mrb[3].mxu1 }
 0x372   : > { %v408_v35 = vsel %vm240_vm3, %v407_v33, -1e+09 }
 0x373   : > { %v570_v36 = vpop.f32.mrb[4].mxu1  ;;  %v409_v37 = vsel %vm159_vm1, %v408_v35, -inf }
 0x374   : > { %v574_v38 = vmul.f32 0.35355338, %v570_v36  ;;  %410 = vmax.xlane.f32.xlu1 %v409_v37  ;;  %v972_v39 = vpop.f32.mrb[5].mxu1 }
 0x376   : > { %v575_v40 = vsel %vm240_vm3, %v574_v38, -1e+09 }
 0x377   : > { %v737_v41 = vpop.f32.mrb[6].mxu1  ;;  %v576_v42 = vsel %vm159_vm1, %v575_v40, -inf }
 0x378   : > { %v741_v43 = vmul.f32 0.35355338, %v737_v41  ;;  %577 = vmax.xlane.f32.xlu0 %v576_v42  ;;  %v982_v44 = vpop.f32.mrb[7].mxu1 }
 0x37a   : > { %v742_v45 = vsel %vm240_vm3, %v741_v43, -1e+09 }
 0x37b   : > { %v743_v46 = vsel %vm159_vm1, %v742_v45, -inf }
 0x37c   : > { %744 = vmax.xlane.f32.xlu1 %v743_v46 }
 0x38d   : > { %420 = vrot.lane.b32.xlu1 %v1091_v1, %s1048_s26 }
 0x401   : > { %v411_v47 = vpop.xlane.xlu1 %410 }
 0x402   : > { %v412_v48 = vsub.f32 %v408_v35, %v411_v47 }
 0x404   : > { %v413_v49 = vmul.f32 1.442695, %v412_v48 }
 0x405   : > { %v578_v50 = vpop.xlane.xlu0 %577 }
 0x406   : > { %1017 = vpow2.f32 %v413_v49  ;;  %v579_v51 = vsub.f32 %v575_v40, %v578_v50 }
 0x408   : > { %v580_v52 = vmul.f32 1.442695, %v579_v51 }
 0x409   : > { %v745_v53 = vpop.xlane.xlu1 %744 }
 0x40a   : > { %1019 = vpow2.f32 %v580_v52  ;;  %v746_v54 = vsub.f32 %v742_v45, %v745_v53 }
 0x40c   : > { %v747_v55 = vmul.f32 1.442695, %v746_v54 }
 0x40d   : > { %v421_v56 = vpop.permute.xlu1 %420 }
 0x40e   : > { %1021 = vpow2.f32 %v747_v55  ;;  %964 = vmatpush3.msra.mxu0 %v421_v56 }
 0x40f   : > { %973 = vmatprep.subr.mxu0 %v1037_v0 }
 0x410   : > { %v1018_v57 = vpop.eup %1017 }
 0x411   : > { %v415_v58 = vsel %vm159_vm1, %v1018_v57, 0.0 }
 0x412   : > { %416 = vadd.xlane.f32.xlu1 %v415_v58 }
 0x414   : > { %v1020_v59 = vpop.eup %1019 }
 0x415   : > { %v582_v60 = vsel %vm159_vm1, %v1020_v59, 0.0 }
 0x416   : > { %583 = vadd.xlane.f32.xlu1 %v582_v60 }
 0x418   : > { %v1022_v61 = vpop.eup %1021 }
 0x419   : > { %v749_v62 = vsel %vm159_vm1, %v1022_v61, 0.0 }
 0x41a   : > { %750 = vadd.xlane.f32.xlu0 %v749_v62 }
 0x427   : > { %754 = vrot.lane.b32.xlu1 %v1091_v1, %s1049_s27 }
 0x430   : > { %587 = vrot.lane.b32.xlu0 %v1091_v1, %s1050_s28 }
 0x49f   : > { %v417_v63 = vpop.xlane.xlu1 %416 }
 0x4a0   : > { %1023 = vrcp.f32 %v417_v63 }
 0x4a3   : > { %v584_v2 = vpop.xlane.xlu1 %583 }
 0x4a4   : > { %1025 = vrcp.f32 %v584_v2 }
 0x4a7   : > { %v751_v3 = vpop.xlane.xlu0 %750  ;;  %v755_v9 = vpop.permute.xlu1 %754 }
 0x4a8   : > { %1027 = vrcp.f32 %v751_v3 }
 0x4aa   : > { %v1024_v4 = vpop.eup %1023 }
 0x4ab   : > { %v419_v5 = vmul.f32 %v1024_v4, %v1018_v57  ;;  %v588_v6 = vpop.permute.xlu0 %587 }
 0x4ad   : > { %966 = vmatmul.mubr.msk.f32.vlgmr.msra.gmra.mrb[2].mxu0 %vm159_vm1, %v419_v5 }
 0x4ae   : > { %v1026_v7 = vpop.eup %1025  ;;  %974 = vmatpush3.msra.mxu0 %v588_v6  ;;  %975 = vmatprep.mubr.msk.f32.mxu0 %vm1038_vm0, %v1037_v0 }
 0x4af   : > { %v586_v8 = vmul.f32 %v1026_v7, %v1020_v59  ;;  %983 = vmatprep.subr.mxu0 %v1037_v0 }
 0x4b1   : > { %976 = vmatmul.mubr.msk.f32.vlgmr.msra.gmra.mrb[4].mxu0 %vm159_vm1, %v586_v8 }
 0x4b2   : > { %v1028_v1 = vpop.eup %1027  ;;  %984 = vmatpush3.msra.mxu0 %v755_v9  ;;  %985 = vmatprep.mubr.msk.f32.mxu0 %vm1038_vm0, %v1037_v0 }
 0x4b3   : > { %v753_v10 = vmul.f32 %v1028_v1, %v1022_v61 }
 0x4b5   : > { %986 = vmatmul.mubr.msk.f32.vlgmr.msra.gmra.mrb[6].mxu0 %vm159_vm1, %v753_v10 }
 0x580   : > { %v492_v11 = vpop.f32.mrb[2].mxu0 }
 0x581   : > { %831 = vrot.lane.b32.xlu1 %v492_v11, %s1051_s29  ;;  %v967_v12 = vpop.f32.mrb[3].mxu0 }
 0x584   : > { %v659_v13 = vpop.f32.mrb[4].mxu0 }
 0x585   : > { %835 = vrot.lane.b32.xlu0 %v659_v13, %s1052_s30  ;;  %v977_v14 = vpop.f32.mrb[5].mxu0 }
 0x588   : > { %v826_v15 = vpop.f32.mrb[6].mxu0 }
 0x589   : > { %839 = vrot.lane.b32.xlu1 %v826_v15, %s1053_s3  ;;  %v987_v16 = vpop.f32.mrb[7].mxu0 }
 0x5f3   : > { %v832_v17 = vpop.permute.xlu1 %831 }
 0x5f4   : > { %v842_v0 = vsel %vm159_vm1, %v1134_v30, %v832_v17 }
 0x5f7   : > { %v836_v18 = vpop.permute.xlu0 %835 }
 0x5f8   : > { %v844_v19 = vsel %vm843_vm4, %v842_v0, %v836_v18 }
 0x5fb   : > { %v840_v20 = vpop.permute.xlu1 %839 }
 0x5fc   : > { %v846_v21 = vsel %vm845_vm5, %v844_v19, %v840_v20 }
 0x5fd   : > { %848 = vst.msk [vmem:[%s152_s6] sm:$0xff] %vm847_vm6, %v846_v21 }
 0x5fe PF: > { %s12_s9 = sadd.s32 1, %s1035_s9  }
 0x5ff   : > { %p9_p4 = scmp.ge.s32.totalorder %s12_s9, 4  }
 0x601   :  { %11 = sbr.rel (!%p9_p4) target bundleno = 1 (0x1), region = 61 }

// kernel: bert_forward.16
= control target key start
LH: loop header
LB: loop body
LE: loop exit
PB: predicated region body
PF: predicated region fallthrough
CT: control target
= control target key end

     0   :  { %vm121_vm0 = vcmask 261120   ;;  %s308_s1 = inlined_call_operand.vmem [shape: f32[128,32], index: 1, kind: input, shape index: {}]   ;;  %s309_s0 = inlined_call_operand.vmem [shape: f32[16,128], index: 0, kind: input, shape index: {}]   ;;  %s310_s2 = inlined_call_operand.vmem [shape: f32[1,32], index: 2, kind: input, shape index: {}]   ;;  %s311_s3 = inlined_call_operand.vmem [shape: f32[16,32], index: 3, kind: input, shape index: {}]   ;;  %s312_s4 = inlined_call_operand.vmem [shape: f32[16,32], index: 4, kind: output, shape index: {}]  }
   0x1   :  { %v19_v0 = vld [vmem:[%s308_s1] sm:$0xff]  ;;  %v20_v1 = vld [vmem:[%s308_s1 + $0x8] sm:$0xff]  ;;  %v21_v2 = vld [vmem:[%s308_s1 + $0x10] sm:$0xff] }
   0x2   :  { %v182_v3 = vpack.c.bf16 %v20_v1, %v19_v0  ;;  %v22_v4 = vld [vmem:[%s308_s1 + $0x18] sm:$0xff]  ;;  %v23_v6 = vld [vmem:[%s308_s1 + $0x20] sm:$0xff]  ;;  %v24_v7 = vld [vmem:[%s308_s1 + $0x28] sm:$0xff] }
   0x3   :  { %v186_v5 = vpack.c.bf16 %v22_v4, %v21_v2  ;;  %v190_v8 = vpack.c.bf16 %v24_v7, %v23_v6  ;;  %v17_v9 = vld [vmem:[%s309_s0] sm:$0xff]  ;;  %v25_v10 = vld [vmem:[%s308_s1 + $0x30] sm:$0xff]  ;;  %v26_v11 = vld [vmem:[%s308_s1 + $0x38] sm:$0xff] }
   0x4   :  { %183 = vmatprep.subr.bf16.mxu0 %v182_v3  ;;  %179 = vmatprep.mubr.f32.mxu0 %v17_v9  ;;  %v194_v12 = vpack.c.bf16 %v26_v11, %v25_v10  ;;  %v27_v13 = vld [vmem:[%s308_s1 + $0x40] sm:$0xff]  ;;  %v28_v14 = vld [vmem:[%s308_s1 + $0x48] sm:$0xff]  ;;  %v29_v16 = vld [vmem:[%s308_s1 + $0x50] sm:$0xff] }
   0x5   :  { %185 = vmatpush3.bf16.msra.mxu0 %v182_v3  ;;  %v198_v15 = vpack.c.bf16 %v28_v14, %v27_v13  ;;  %v30_v17 = vld [vmem:[%s308_s1 + $0x58] sm:$0xff]  ;;  %v31_v19 = vld [vmem:[%s308_s1 + $0x60] sm:$0xff]  ;;  %v32_v20 = vld [vmem:[%s308_s1 + $0x68] sm:$0xff] }
   0x6   :  { %187 = vmatprep.subr.bf16.mxu0 %v186_v5  ;;  %v202_v18 = vpack.c.bf16 %v30_v17, %v29_v16  ;;  %v206_v21 = vpack.c.bf16 %v32_v20, %v31_v19  ;;  %v33_v22 = vld [vmem:[%s308_s1 + $0x70] sm:$0xff]  ;;  %v34_v23 = vld [vmem:[%s308_s1 + $0x78] sm:$0xff]  ;;  %v18_v25 = vld [vmem:[%s309_s0 + $0x8] sm:$0xff] }
   0x7   :  { %v210_v24 = vpack.c.bf16 %v34_v23, %v33_v22  ;;  %v128_v26 = vld [vmem:[%s310_s2] ss:$0 sm:$0xff]  ;;  %v118_v28 = vld [vmem:[%s311_s3 + $0x8] sm:$0xff] }
   0x8   :  { %v117_v31 = vld [vmem:[%s311_s3] sm:$0xff] }
   0x9   :  { %189 = vmatpush3.bf16.msra.mxu0 %v186_v5 }
   0xa   :  { %191 = vmatprep.subr.bf16.mxu0 %v190_v8 }
   0xd   :  { %193 = vmatpush3.bf16.msra.mxu0 %v190_v8 }
   0xe   :  { %195 = vmatprep.subr.bf16.mxu0 %v194_v12 }
  0x11   :  { %197 = vmatpush3.bf16.msra.mxu0 %v194_v12 }
  0x12   :  { %199 = vmatprep.subr.bf16.mxu0 %v198_v15 }
  0x15   :  { %201 = vmatpush3.bf16.msra.mxu0 %v198_v15 }
  0x16   :  { %203 = vmatprep.subr.bf16.mxu0 %v202_v18 }
  0x19   :  { %205 = vmatpush3.bf16.msra.mxu0 %v202_v18 }
  0x1a   :  { %207 = vmatprep.subr.bf16.mxu0 %v206_v21 }
  0x1d   :  { %209 = vmatpush3.bf16.msra.mxu0 %v206_v21 }
  0x1e   :  { %211 = vmatprep.subr.bf16.mxu0 %v210_v24 }
  0x21   :  { %213 = vmatpush3.bf16.msra.mxu0 %v210_v24 }
  0x24   :  { %180 = vmatmul.mubr.f32.vlgmr.msra.gmra.mrb[0].mxu0 %v18_v25 }
  0xf7   :  { %v181_v27 = vpop.f32.mrb[0].mxu0 }
  0xf8   :  { %v114_v29 = vadd.f32 %v181_v27, %v128_v26  ;;  %v108_v30 = vpop.f32.mrb[1].mxu0 }
  0xf9   :  { %v109_v32 = vadd.f32 %v128_v26, %v108_v30 }
  0xfa   :  { %v120_v33 = vadd.f32 %v118_v28, %v114_v29 }
  0xfb   :  { %v119_v34 = vadd.f32 %v117_v31, %v109_v32 }
  0xfc   :  { %123 = vst.msk [vmem:[%s312_s4 + $0x8] sm:$0xff] %vm121_vm0, %v120_v33 }
  0xfd   :  { %122 = vst.msk [vmem:[%s312_s4] sm:$0xff] %vm121_vm0, %v119_v34 }

// kernel: bert_forward.15
= control target key start
LH: loop header
LB: loop body
LE: loop exit
PB: predicated region body
PF: predicated region fallthrough
CT: control target
= control target key end

     0   :  { %vm22_vm0 = vcmask 261120   ;;  %s310_s0 = inlined_call_operand.vmem [shape: f32[16,32], index: 0, kind: input, shape index: {}]   ;;  %s311_s3 = inlined_call_operand.vmem [shape: f32[32,128], index: 3, kind: input, shape index: {}]   ;;  %s312_s1 = inlined_call_operand.vmem [shape: f32[1,32], index: 1, kind: input, shape index: {}]   ;;  %s313_s2 = inlined_call_operand.vmem [shape: f32[1,32], index: 2, kind: input, shape index: {}]   ;;  %s314_s4 = inlined_call_operand.vmem [shape: f32[1,128], index: 4, kind: input, shape index: {}]   ;;  %s315_s5 = inlined_call_operand.vmem [shape: f32[16,128], index: 5, kind: output, shape index: {}]  }
   0x1   :  { %v20_v0 = vld [vmem:[%s310_s0] sm:$0xff]  ;;  %v21_v1 = vld [vmem:[%s310_s0 + $0x8] sm:$0xff]  ;;  %v85_v16 = vld [vmem:[%s311_s3 + $0x10] sm:$0xff] }
   0x2   :  { %v23_v2 = vsel %vm22_vm0, %v20_v0, 0.0  ;;  %v26_v3 = vsel %vm22_vm0, %v21_v1, 0.0  ;;  %v83_v14 = vld [vmem:[%s311_s3] sm:$0xff]  ;;  %v84_v15 = vld [vmem:[%s311_s3 + $0x8] sm:$0xff]  ;;  %v86_v18 = vld [vmem:[%s311_s3 + $0x18] sm:$0xff] }
   0x3   :  { %24 = vadd.xlane.f32.xlu0 %v23_v2  ;;  %v221_v17 = vpack.c.bf16 %v84_v15, %v83_v14  ;;  %v225_v19 = vpack.c.bf16 %v86_v18, %v85_v16  ;;  %v199_v36 = vld [vmem:[%s312_s1] ss:$0 sm:$0xff] }
   0x4   :  { %v200_v39 = vld [vmem:[%s313_s2] ss:$0 sm:$0xff] }
   0x5   :  { %222 = vmatprep.subr.bf16.mxu0 %v221_v17  ;;  %v201_v46 = vld [vmem:[%s314_s4] ss:$0 sm:$0xff] }
   0x6   :  { %224 = vmatpush3.bf16.msra.mxu0 %v221_v17 }
   0x7   :  { %27 = vadd.xlane.f32.xlu0 %v26_v3  ;;  %226 = vmatprep.subr.bf16.mxu0 %v225_v19 }
   0xa   :  { %228 = vmatpush3.bf16.msra.mxu0 %v225_v19 }
  0x90   :  { %v25_v4 = vpop.xlane.xlu0 %24 }
  0x91   :  { %v30_v5 = vmul.f32 0.03125, %v25_v4 }
  0x93   :  { %v32_v6 = vsub.f32 %v20_v0, %v30_v5 }
  0x94   :  { %v28_v7 = vpop.xlane.xlu0 %27 }
  0x95   :  { %v31_v8 = vmul.f32 0.03125, %v28_v7  ;;  %v34_v9 = vmul.f32 %v32_v6, %v32_v6  ;;  %v52_v37 = vmul.f32 %v199_v36, %v32_v6 }
  0x97   :  { %v33_v10 = vsub.f32 %v21_v1, %v31_v8  ;;  %v36_v11 = vsel %vm22_vm0, %v34_v9, 0.0 }
  0x98   :  { %37 = vadd.xlane.f32.xlu1 %v36_v11 }
  0x99   :  { %v35_v12 = vmul.f32 %v33_v10, %v33_v10  ;;  %v53_v41 = vmul.f32 %v199_v36, %v33_v10 }
  0x9b   :  { %v39_v13 = vsel %vm22_vm0, %v35_v12, 0.0 }
  0x9c   :  { %40 = vadd.xlane.f32.xlu1 %v39_v13 }
 0x125   :  { %v38_v20 = vpop.xlane.xlu1 %37 }
 0x126   :  { %v43_v21 = vmul.f32 0.032258064, %v38_v20 }
 0x128   :  { %229 = vrsqrt.f32 %v43_v21  ;;  %vm56_vm1 = vcmp.eq.f32.partialorder %v43_v21, inf  ;;  %v59_v26 = vand.u32 2147483648, %v43_v21  ;;  %vm58_vm2 = vcmp.eq.f32.partialorder %v43_v21, 0.0 }
 0x129   :  { %v41_v22 = vpop.xlane.xlu1 %40 }
 0x12a   :  { %v44_v23 = vmul.f32 0.032258064, %v41_v22 }
 0x12c   :  { %231 = vrsqrt.f32 %v44_v23  ;;  %vm63_vm3 = vcmp.eq.f32.partialorder %v44_v23, inf  ;;  %v66_v32 = vand.u32 2147483648, %v44_v23  ;;  %vm65_vm4 = vcmp.eq.f32.partialorder %v44_v23, 0.0 }
 0x132   :  { %v230_v24 = vpop.eup %229 }
 0x133   :  { %v55_v25 = vmul.f32 %v230_v24, %v43_v21 }
 0x135   :  { %v57_v27 = vsel %vm56_vm1, %v43_v21, %v55_v25 }
 0x136   :  { %v232_v28 = vpop.eup %231  ;;  %v60_v29 = vsel %vm58_vm2, %v59_v26, %v57_v27 }
 0x137   :  { %v62_v30 = vmul.f32 %v232_v28, %v44_v23  ;;  %v68_v31 = vadd.f32 1e-06, %v60_v29 }
 0x139   :  { %v64_v33 = vsel %vm63_vm3, %v44_v23, %v62_v30  ;;  %233 = vrcp.f32 %v68_v31 }
 0x13a   :  { %v67_v34 = vsel %vm65_vm4, %v66_v32, %v64_v33 }
 0x13b   :  { %v69_v35 = vadd.f32 1e-06, %v67_v34 }
 0x13d   :  { %235 = vrcp.f32 %v69_v35 }
 0x143   :  { %v234_v38 = vpop.eup %233 }
 0x144   :  { %v71_v40 = vmul.f32 %v234_v38, %v52_v37 }
 0x146   :  { %v81_v42 = vadd.f32 %v200_v39, %v71_v40 }
 0x147   :  { %v236_v43 = vpop.eup %235 }
 0x148   :  { %v73_v44 = vmul.f32 %v236_v43, %v53_v41  ;;  %218 = vmatprep.mubr.msk.f32.mxu0 %vm22_vm0, %v81_v42 }
 0x14a   :  { %v82_v45 = vadd.f32 %v200_v39, %v73_v44 }
 0x14c   :  { %219 = vmatmul.mubr.msk.f32.vlgmr.msra.gmra.mrb[0].mxu0 %vm22_vm0, %v82_v45 }
 0x21f   :  { %v220_v47 = vpop.f32.mrb[0].mxu0 }
 0x220   :  { %v172_v48 = vadd.f32 %v220_v47, %v201_v46  ;;  %v166_v49 = vpop.f32.mrb[1].mxu0 }
 0x221   :  { %v167_v50 = vadd.f32 %v201_v46, %v166_v49 }
 0x222   :  { %v178_v51 = vmul.f32 0.044715, %v172_v48  ;;  %v176_v63 = vmul.f32 0.5, %v172_v48 }
 0x223   :  { %v177_v52 = vmul.f32 0.044715, %v167_v50  ;;  %v175_v1 = vmul.f32 0.5, %v167_v50 }
 0x224   :  { %v180_v53 = vmul.f32 %v178_v51, %v172_v48 }
 0x225   :  { %v179_v54 = vmul.f32 %v177_v52, %v167_v50 }
 0x226   :  { %v182_v55 = vmul.f32 %v180_v53, %v172_v48 }
 0x227   :  { %v181_v56 = vmul.f32 %v179_v54, %v167_v50 }
 0x228   :  { %v184_v57 = vadd.f32 %v182_v55, %v172_v48 }
 0x229   :  { %v183_v58 = vadd.f32 %v181_v56, %v167_v50 }
 0x22a   :  { %v186_v59 = vmul.f32 0.7978846, %v184_v57 }
 0x22b   :  { %v185_v60 = vmul.f32 0.7978846, %v183_v58 }
 0x22c   :  { %237 = vtanh.f32 %v186_v59 }
 0x22d   :  { %239 = vtanh.f32 %v185_v60 }
 0x236   :  { %v238_v61 = vpop.eup %237 }
 0x237   :  { %v240_v62 = vpop.eup %239  ;;  %v190_v0 = vadd.f32 1.0, %v238_v61 }
 0x238   :  { %v189_v2 = vadd.f32 1.0, %v240_v62 }
 0x239   :  { %v192_v3 = vmul.f32 %v190_v0, %v176_v63 }
 0x23a   :  { %v191_v4 = vmul.f32 %v189_v2, %v175_v1 }
 0x23b   :  { %194 = vst [vmem:[%s315_s5 + $0x8] sm:$0xff] %v192_v3 }
 0x23c   :  { %193 = vst [vmem:[%s315_s5] sm:$0xff] %v191_v4 }

// kernel: bert_forward.21
= control target key start
LH: loop header
LB: loop body
LE: loop exit
PB: predicated region body
PF: predicated region fallthrough
CT: control target
= control target key end

     0   :  { %s357_s0 = inlined_call_operand.vmem [shape: f32[16,128], index: 0, kind: input, shape index: {}]   ;;  %s358_s1 = inlined_call_operand.vmem [shape: f32[128,32], index: 1, kind: input, shape index: {}]   ;;  %s359_s2 = inlined_call_operand.vmem [shape: f32[1,32], index: 2, kind: input, shape index: {}]   ;;  %s360_s3 = inlined_call_operand.vmem [shape: f32[16,32], index: 3, kind: input, shape index: {}]   ;;  %s361_s4 = inlined_call_operand.hbm [shape: f32[16,32], index: 4, kind: output, shape index: {}]  }
   0x1   :  { %v20_v0 = vld [vmem:[%s358_s1] sm:$0xff]  ;;  %v21_v1 = vld [vmem:[%s358_s1 + $0x8] sm:$0xff]  ;;  %v22_v2 = vld [vmem:[%s358_s1 + $0x10] sm:$0xff] }
   0x2   :  { %v195_v3 = vpack.c.bf16 %v21_v1, %v20_v0  ;;  %v23_v4 = vld [vmem:[%s358_s1 + $0x18] sm:$0xff]  ;;  %v24_v6 = vld [vmem:[%s358_s1 + $0x20] sm:$0xff]  ;;  %v25_v7 = vld [vmem:[%s358_s1 + $0x28] sm:$0xff] }
   0x3   :  { %v199_v5 = vpack.c.bf16 %v23_v4, %v22_v2  ;;  %v203_v8 = vpack.c.bf16 %v25_v7, %v24_v6  ;;  %v18_v9 = vld [vmem:[%s357_s0] sm:$0xff]  ;;  %v26_v10 = vld [vmem:[%s358_s1 + $0x30] sm:$0xff]  ;;  %v27_v11 = vld [vmem:[%s358_s1 + $0x38] sm:$0xff] }
   0x4   :  { %196 = vmatprep.subr.bf16.mxu0 %v195_v3  ;;  %192 = vmatprep.mubr.f32.mxu0 %v18_v9 }
   0x5   :  { %198 = vmatpush3.bf16.msra.mxu0 %v195_v3 }
   0x6   :  { %200 = vmatprep.subr.bf16.mxu0 %v199_v5 }
   0x7   :  { %9 = vsyncpa [#allocation3], 0  ;;  %v207_v12 = vpack.c.bf16 %v27_v11, %v26_v10  ;;  %v28_v13 = vld [vmem:[%s358_s1 + $0x40] sm:$0xff]  ;;  %v29_v14 = vld [vmem:[%s358_s1 + $0x48] sm:$0xff]  ;;  %vm122_vm0 = vcmask 261120  }
   0x8   :  { %v211_v15 = vpack.c.bf16 %v29_v14, %v28_v13  ;;  %v30_v16 = vld [vmem:[%s358_s1 + $0x50] sm:$0xff]  ;;  %v31_v17 = vld [vmem:[%s358_s1 + $0x58] sm:$0xff]  ;;  %v32_v19 = vld [vmem:[%s358_s1 + $0x60] sm:$0xff] }
   0x9   :  { %202 = vmatpush3.bf16.msra.mxu0 %v199_v5  ;;  %v215_v18 = vpack.c.bf16 %v31_v17, %v30_v16  ;;  %v33_v20 = vld [vmem:[%s358_s1 + $0x68] sm:$0xff]  ;;  %v34_v22 = vld [vmem:[%s358_s1 + $0x70] sm:$0xff]  ;;  %v35_v23 = vld [vmem:[%s358_s1 + $0x78] sm:$0xff]  ;;  %s254_s1 = smov [#allocation2]  }
   0xa   :  { %204 = vmatprep.subr.bf16.mxu0 %v203_v8  ;;  %v219_v21 = vpack.c.bf16 %v33_v20, %v32_v19  ;;  %v223_v24 = vpack.c.bf16 %v35_v23, %v34_v22  ;;  %v19_v25 = vld [vmem:[%s357_s0 + $0x8] sm:$0xff]  ;;  %v141_v26 = vld [vmem:[%s359_s2] ss:$0 sm:$0xff]  ;;  %s130_s29 = sshll.u32 %s254_s1, 4  ;;  %s131_s29 = int_to_ptr.vmem [resolvable:$true] %s130_s29 }
   0xb   :  { %v119_v28 = vld [vmem:[%s360_s3 + $0x8] sm:$0xff]  ;;  %v118_v31 = vld [vmem:[%s360_s3] sm:$0xff]  ;;  %s230_s0 = scalar_lea.vmem %s131_s29, 256  ;;  %p235_p1 = scmp.lt.s32.totalorder %s131_s29, %s131_s29 }
   0xc   :  { %p231_p0 = scmp.ne.s32.totalorder %s131_s29, %s230_s0  ;;  %p236_p2 = scmp.lt.s32.totalorder %s230_s0, %s230_s0 }
   0xd   :  { %206 = vmatpush3.bf16.msra.mxu0 %v203_v8 }
   0xe   :  { %208 = vmatprep.subr.bf16.mxu0 %v207_v12  ;;  %p237_p3 = por %p236_p2, %p235_p1 }
  0x10   :  { %p238_p4 = pnand %p237_p3, %p231_p0 }
  0x11   :  { %210 = vmatpush3.bf16.msra.mxu0 %v207_v12 }
  0x12   :  { %212 = vmatprep.subr.bf16.mxu0 %v211_v15 }
  0x15   :  { %214 = vmatpush3.bf16.msra.mxu0 %v211_v15 }
  0x16   :  { %216 = vmatprep.subr.bf16.mxu0 %v215_v18 }
  0x19   :  { %218 = vmatpush3.bf16.msra.mxu0 %v215_v18 }
  0x1a   :  { %220 = vmatprep.subr.bf16.mxu0 %v219_v21 }
  0x1d   :  { %222 = vmatpush3.bf16.msra.mxu0 %v219_v21 }
  0x1e   :  { %224 = vmatprep.subr.bf16.mxu0 %v223_v24 }
  0x21   :  { %226 = vmatpush3.bf16.msra.mxu0 %v223_v24 }
  0x24   :  { %193 = vmatmul.mubr.f32.vlgmr.msra.gmra.mrb[0].mxu0 %v19_v25 }
  0xf7   :  { %v194_v27 = vpop.f32.mrb[0].mxu0 }
  0xf8   :  { %v115_v29 = vadd.f32 %v194_v27, %v141_v26  ;;  %v109_v30 = vpop.f32.mrb[1].mxu0 }
  0xf9   :  { %v110_v32 = vadd.f32 %v141_v26, %v109_v30 }
  0xfa   :  { %v121_v33 = vadd.f32 %v119_v28, %v115_v29 }
  0xfb   :  { %v120_v34 = vadd.f32 %v118_v31, %v110_v32 }
  0xfc   :  { %124 = vst.msk [vmem:[#allocation2 + $0x8] sm:$0xff] %vm122_vm0, %v121_v33 }
  0xfd   :  { %123 = vst.msk [vmem:[#allocation2] sm:$0xff] %vm122_vm0, %v120_v34 }
  0xfe   :  { %241 = shalt.err (!%p238_p4)
}
  0xff   :  { %s242_s7 = scalar_lea.hbm %s361_s4, 256 }
 0x100   :  { %p243_p5 = scmp.ne.s32.totalorder %s361_s4, %s242_s7  ;;  %p246_p6 = scmp.lt.u32.totalorder %s242_s7, %s361_s4 }
 0x102   :  { %p248_p7 = pnand %p246_p6, %p243_p5 }
 0x104   :  { %251 = shalt.err (!%p248_p7)
}
 0x105   :  { %s255_s11 = smov 128   ;;  %s256_s12 = smov 8  }
 0x106   :  { %136 = dma.vmem_to_hbm [thread:$0]  %s131_s29, 256, %s361_s4, [#allocation3], %s255_s11, %s255_s11, %s256_s12  }
 0x107   :  { %252 = dma.done.wait [#allocation3], 256  }
 0x108   :  { %253 = vsyncadd [#allocation3], 4294967040 }
 0x109   :  { %140 = vsyncpa [#allocation3], 1 }

</bundles_post_ra>
